<compile_context>
chip_gen: v5e
topology: v5e:2x2
jax: 0.10.0
libtpu: 0.0.40
codegen_flags: <defaults>
</compile_context>

<pallas_src>
import functools

import jax
import jax.numpy as jnp
from jax.experimental import pallas as pl
from jax.experimental.pallas import tpu as pltpu

EPS = 1e-5  # PyTorch InstanceNorm2d default eps

# 3x3 taps in (kh, kw) raster order; must match the weight reshape below.
_TAPS = tuple((dh, dw) for dh in (-1, 0, 1) for dw in (-1, 0, 1))


def _residual_block_kernel(x_ref, mask_ref, w1_ref, w2_ref,
                           g1_ref, b1_ref, g2_ref, b2_ref,
                           o_ref, xcol_ref, *, C, H, W, B_blk):
  """One packed batch block per grid step; lane-dense (B_blk*C, H*W) layout.

  x_ref    : (1, BC, HW)      packed input block (BC = B_blk*C)
  mask_ref : (9, HW)          resident f32 border masks (zero-padding emulation)
  w*_ref   : (BC, 9*BC)       resident block-diagonal im2col conv weights
  g*/b*    : (BC, 1)          resident InstanceNorm affine params (tiled/sample)
  o_ref    : (1, BC, HW)      packed output block
  xcol_ref : (9*BC, HW) VMEM  im2col scratch (fully overwritten each conv)
  """
  HW = H * W
  BC = B_blk * C
  inv_hw = jnp.float32(1.0 / HW)

  xm = x_ref[0].astype(jnp.float32)                       # (BC, HW)

  def conv3x3(inp, w_ref):
    # im2col: 9 lane-shifted, border-masked copies -> VMEM scratch, then one
    # MXU dot produces every (sample, out-channel) row at once.
    for t, (dh, dw) in enumerate(_TAPS):
      s = dh * W + dw
      if s == 0:
        xt = inp
      else:
        xt = pltpu.roll(inp, (-s) % HW, 1) * mask_ref[t:t + 1, :]
      xcol_ref[t * BC:(t + 1) * BC, :] = xt
    return jnp.dot(w_ref[...], xcol_ref[...],
                   preferred_element_type=jnp.float32,
                   precision=jax.lax.Precision.HIGHEST)

  def inst_norm(h, g_col, b_col):
    # Two-pass per-row (per sample, per channel) stats over the HW lanes.
    mean = jnp.sum(h, axis=1, keepdims=True) * inv_hw      # (BC, 1)
    d = h - mean
    var = jnp.sum(d * d, axis=1, keepdims=True) * inv_hw   # biased variance
    return d * jax.lax.rsqrt(var + EPS) * g_col + b_col

  h = conv3x3(xm, w1_ref)
  h = jnp.maximum(inst_norm(h, g1_ref[...], b1_ref[...]), 0.0)   # IN1 + ReLU
  h = conv3x3(h, w2_ref)
  h = inst_norm(h, g2_ref[...], b2_ref[...])                     # IN2

  o_ref[0] = (xm + h).astype(o_ref.dtype)                        # residual add


def _pick_batch_block(N, C):
  """Smallest divisor of N so B_blk*C fills the 8 sublanes; else 1."""
  for b in range(1, N + 1):
    if N % b == 0 and (b * C) % 8 == 0:
      return b
  return 1


def _border_mask(H, W):
  """(9, H*W) float32 masks emulating the conv's zero padding per tap."""
  hh = jnp.arange(H).reshape(H, 1)
  ww = jnp.arange(W).reshape(1, W)
  rows = []
  for dh, dw in _TAPS:
    valid = ((hh + dh >= 0) & (hh + dh < H) &
             (ww + dw >= 0) & (ww + dw < W))
    rows.append(valid.reshape(1, H * W))
  return jnp.concatenate(rows, axis=0).astype(jnp.float32)


def _conv_weight_im2col(w, B_blk):
  """OIHW (C,C,3,3) -> lane-dense block-diagonal im2col weight (BC, 9*BC)."""
  C_out, C_in = w.shape[0], w.shape[1]
  w_taps = jnp.transpose(w, (2, 3, 0, 1)).reshape(9, C_out, C_in)  # [t, co, ci]
  eye = jnp.eye(B_blk, dtype=w.dtype)
  wbd = jnp.einsum('bB,toi->tboBi', eye, w_taps)       # (9, B, Co, B, Ci)
  wbd = wbd.reshape(9, B_blk * C_out, B_blk * C_in)
  return jnp.transpose(wbd, (1, 0, 2)).reshape(B_blk * C_out,
                                               9 * B_blk * C_in)


def residual_block(x, w1, w2, g1, b1, g2, b2):
  """x: (N, C, H, W); w1, w2: (C, C, 3, 3) OIHW; g*/b*: (C,)."""
  N, C, H, W = x.shape
  assert w1.shape[0] == C and w2.shape[0] == C, \
      "residual add requires dim_in == dim_out"
  HW = H * W

  B_blk = _pick_batch_block(N, C)
  G = N // B_blk
  BC = B_blk * C

  # Layout-only glue: pack B_blk consecutive samples onto the sublane axis,
  # flatten spatial onto lanes, build lane-dense im2col weights and tiled
  # per-row affine params, precompute the border masks once.
  xf = x.reshape(G, BC, HW)
  w1c = _conv_weight_im2col(w1, B_blk)
  w2c = _conv_weight_im2col(w2, B_blk)
  g1c = jnp.tile(g1, B_blk).reshape(BC, 1)
  b1c = jnp.tile(b1, B_blk).reshape(BC, 1)
  g2c = jnp.tile(g2, B_blk).reshape(BC, 1)
  b2c = jnp.tile(b2, B_blk).reshape(BC, 1)
  mask = _border_mask(H, W)                              # (9, HW)

  kern = functools.partial(_residual_block_kernel, C=C, H=H, W=W, B_blk=B_blk)
  resident = lambda g: (0, 0)   # weights / masks / params: same block each step

  out = pl.pallas_call(
      kern,
      out_shape=jax.ShapeDtypeStruct((G, BC, HW), x.dtype),
      grid=(G,),
      in_specs=[
          pl.BlockSpec((1, BC, HW), lambda g: (g, 0, 0)),   # packed input
          pl.BlockSpec((9, HW), resident),                   # border masks
          pl.BlockSpec((BC, 9 * BC), resident),              # conv1 weights
          pl.BlockSpec((BC, 9 * BC), resident),              # conv2 weights
          pl.BlockSpec((BC, 1), resident),                   # IN1 gamma
          pl.BlockSpec((BC, 1), resident),                   # IN1 beta
          pl.BlockSpec((BC, 1), resident),                   # IN2 gamma
          pl.BlockSpec((BC, 1), resident),                   # IN2 beta
      ],
      out_specs=pl.BlockSpec((1, BC, HW), lambda g: (g, 0, 0)),
      scratch_shapes=[pltpu.VMEM((9 * BC, HW), jnp.float32)],  # im2col scratch
      compiler_params=pltpu.CompilerParams(
          dimension_semantics=("parallel",)),   # batch blocks are independent
  )(xf, mask, w1c, w2c, g1c, b1c, g2c, b2c)
  return out.reshape(N, C, H, W)


# ---------------- pure-JAX reference (for verification) ----------------
def _instance_norm_ref(h, g, b):
  m = h.mean(axis=(2, 3), keepdims=True)
  v = ((h - m) ** 2).mean(axis=(2, 3), keepdims=True)   # biased variance
  return (h - m) * jax.lax.rsqrt(v + EPS) * g[None, :, None, None] \
      + b[None, :, None, None]


def residual_block_ref(x, w1, w2, g1, b1, g2, b2):
  dn = ("NCHW", "OIHW", "NCHW")
  h = jax.lax.conv_general_dilated(x, w1, (1, 1), ((1, 1), (1, 1)),
                                   dimension_numbers=dn)
  h = jax.nn.relu(_instance_norm_ref(h, g1, b1))
  h = jax.lax.conv_general_dilated(h, w2, (1, 1), ((1, 1), (1, 1)),
                                   dimension_numbers=dn)
  h = _instance_norm_ref(h, g2, b2)
  return x + h


if __name__ == "__main__":
  # NOTE: PyTorch InstanceNorm2d(track_running_stats=True) in training mode
  # normalizes with per-instance statistics, which is what we implement here.
  # TODO(synk): running-stats buffer updates (training side effect) are not modeled.
  N, C, H, W = 2, 4, 16, 16

  key = jax.random.PRNGKey(0)
  kx, k1, k2, kg1, kb1, kg2, kb2 = jax.random.split(key, 7)

  x = jax.random.normal(kx, (N, C, H, W), dtype=jnp.float32)
  w1 = 0.3 * jax.random.normal(k1, (C, C, 3, 3), dtype=jnp.float32)   # conv1: OIHW
  w2 = 0.3 * jax.random.normal(k2, (C, C, 3, 3), dtype=jnp.float32)   # conv2: OIHW
  g1 = 1.0 + 0.1 * jax.random.normal(kg1, (C,), dtype=jnp.float32)    # IN1 weight
  b1 = 0.1 * jax.random.normal(kb1, (C,), dtype=jnp.float32)          # IN1 bias
  g2 = 1.0 + 0.1 * jax.random.normal(kg2, (C,), dtype=jnp.float32)    # IN2 weight
  b2 = 0.1 * jax.random.normal(kb2, (C,), dtype=jnp.float32)          # IN2 bias

  out = jax.block_until_ready(residual_block(x, w1, w2, g1, b1, g2, b2))

  ref = residual_block_ref(x, w1, w2, g1, b1, g2, b2)
  assert out.shape == (N, C, H, W) and out.dtype == jnp.float32
  max_err = float(jnp.max(jnp.abs(out - ref)))
  assert jnp.allclose(out, ref, atol=2e-3, rtol=2e-3), f"max abs err {max_err}"

  print("KERNEL_OK")
</pallas_src>

<mosaic_0001>
module attributes {stable_mosaic.version = 11 : i64} {
  func.func @_residual_block_kernel(%arg0: i32, %arg1: memref<1x8x256xf32, #tpu.memory_space<vmem>>, %arg2: memref<9x256xf32, #tpu.memory_space<vmem>>, %arg3: memref<8x72xf32, #tpu.memory_space<vmem>>, %arg4: memref<8x72xf32, #tpu.memory_space<vmem>>, %arg5: memref<8x1xf32, #tpu.memory_space<vmem>>, %arg6: memref<8x1xf32, #tpu.memory_space<vmem>>, %arg7: memref<8x1xf32, #tpu.memory_space<vmem>>, %arg8: memref<8x1xf32, #tpu.memory_space<vmem>>, %arg9: memref<1x8x256xf32, #tpu.memory_space<vmem>>, %arg10: memref<72x256xf32, #tpu.memory_space<vmem>>) attributes {dimension_semantics = [#tpu.dimension_semantics<parallel>], iteration_bounds = array<i64: 1>, scalar_prefetch = 0 : i64, scratch_operands = 1 : i64, tpu.core_type = #tpu.core_type<tc>, window_params = [{transform_indices = @transform_0, window_bounds = array<i64: 1, 8, 256>}, {pipeline_mode = #tpu.pipeline_mode<synchronous>, transform_indices = @transform_1, window_bounds = array<i64: 9, 256>}, {pipeline_mode = #tpu.pipeline_mode<synchronous>, transform_indices = @transform_2, window_bounds = array<i64: 8, 72>}, {pipeline_mode = #tpu.pipeline_mode<synchronous>, transform_indices = @transform_3, window_bounds = array<i64: 8, 72>}, {pipeline_mode = #tpu.pipeline_mode<synchronous>, transform_indices = @transform_4, window_bounds = array<i64: 8, 1>}, {pipeline_mode = #tpu.pipeline_mode<synchronous>, transform_indices = @transform_5, window_bounds = array<i64: 8, 1>}, {pipeline_mode = #tpu.pipeline_mode<synchronous>, transform_indices = @transform_6, window_bounds = array<i64: 8, 1>}, {pipeline_mode = #tpu.pipeline_mode<synchronous>, transform_indices = @transform_7, window_bounds = array<i64: 8, 1>}, {transform_indices = @transform_8, window_bounds = array<i64: 1, 8, 256>}]} {
    %c0 = arith.constant 0 : index
    %c0_0 = arith.constant 0 : index
    %c0_1 = arith.constant 0 : index
    %0 = vector.load %arg1[%c0, %c0_0, %c0_1] : memref<1x8x256xf32, #tpu.memory_space<vmem>>, vector<1x8x256xf32>
    %1 = vector.shape_cast %0 : vector<1x8x256xf32> to vector<8x256xf32>
    %c17_i32 = arith.constant 17 : i32
    %2 = tpu.dynamic_rotate %1 by %c17_i32 dim 1 : vector<8x256xf32>, i32 -> vector<8x256xf32>
    %c0_2 = arith.constant 0 : index
    %c0_3 = arith.constant 0 : index
    %3 = vector.load %arg2[%c0_2, %c0_3] : memref<9x256xf32, #tpu.memory_space<vmem>>, vector<1x256xf32>
    %4 = vector.broadcast %3 : vector<1x256xf32> to vector<8x256xf32>
    %5 = arith.mulf %2, %4 : vector<8x256xf32>
    %c0_4 = arith.constant 0 : index
    %c0_5 = arith.constant 0 : index
    %6 = vector.load %arg10[%c0_4, %c0_5] : memref<72x256xf32, #tpu.memory_space<vmem>>, vector<8x256xf32>
    tpu.vector_store %arg10[%c0_4, %c0_5], %5 {strides = array<i32>} : memref<72x256xf32, #tpu.memory_space<vmem>>, vector<8x256xf32>,
    %c16_i32 = arith.constant 16 : i32
    %7 = tpu.dynamic_rotate %1 by %c16_i32 dim 1 : vector<8x256xf32>, i32 -> vector<8x256xf32>
    %c1 = arith.constant 1 : index
    %c0_6 = arith.constant 0 : index
    %8 = vector.load %arg2[%c1, %c0_6] : memref<9x256xf32, #tpu.memory_space<vmem>>, vector<1x256xf32>
    %9 = vector.broadcast %8 : vector<1x256xf32> to vector<8x256xf32>
    %10 = arith.mulf %7, %9 : vector<8x256xf32>
    %c8 = arith.constant 8 : index
    %c0_7 = arith.constant 0 : index
    %11 = vector.load %arg10[%c8, %c0_7] : memref<72x256xf32, #tpu.memory_space<vmem>>, vector<8x256xf32>
    tpu.vector_store %arg10[%c8, %c0_7], %10 {strides = array<i32>} : memref<72x256xf32, #tpu.memory_space<vmem>>, vector<8x256xf32>,
    %c15_i32 = arith.constant 15 : i32
    %12 = tpu.dynamic_rotate %1 by %c15_i32 dim 1 : vector<8x256xf32>, i32 -> vector<8x256xf32>
    %c2 = arith.constant 2 : index
    %c0_8 = arith.constant 0 : index
    %13 = vector.load %arg2[%c2, %c0_8] : memref<9x256xf32, #tpu.memory_space<vmem>>, vector<1x256xf32>
    %14 = vector.broadcast %13 : vector<1x256xf32> to vector<8x256xf32>
    %15 = arith.mulf %12, %14 : vector<8x256xf32>
    %c16 = arith.constant 16 : index
    %c0_9 = arith.constant 0 : index
    %16 = vector.load %arg10[%c16, %c0_9] : memref<72x256xf32, #tpu.memory_space<vmem>>, vector<8x256xf32>
    tpu.vector_store %arg10[%c16, %c0_9], %15 {strides = array<i32>} : memref<72x256xf32, #tpu.memory_space<vmem>>, vector<8x256xf32>,
    %c1_i32 = arith.constant 1 : i32
    %17 = tpu.dynamic_rotate %1 by %c1_i32 dim 1 : vector<8x256xf32>, i32 -> vector<8x256xf32>
    %c3 = arith.constant 3 : index
    %c0_10 = arith.constant 0 : index
    %18 = vector.load %arg2[%c3, %c0_10] : memref<9x256xf32, #tpu.memory_space<vmem>>, vector<1x256xf32>
    %19 = vector.broadcast %18 : vector<1x256xf32> to vector<8x256xf32>
    %20 = arith.mulf %17, %19 : vector<8x256xf32>
    %c24 = arith.constant 24 : index
    %c0_11 = arith.constant 0 : index
    %21 = vector.load %arg10[%c24, %c0_11] : memref<72x256xf32, #tpu.memory_space<vmem>>, vector<8x256xf32>
    tpu.vector_store %arg10[%c24, %c0_11], %20 {strides = array<i32>} : memref<72x256xf32, #tpu.memory_space<vmem>>, vector<8x256xf32>,
    %c32 = arith.constant 32 : index
    %c0_12 = arith.constant 0 : index
    %22 = vector.load %arg10[%c32, %c0_12] : memref<72x256xf32, #tpu.memory_space<vmem>>, vector<8x256xf32>
    tpu.vector_store %arg10[%c32, %c0_12], %1 {strides = array<i32>} : memref<72x256xf32, #tpu.memory_space<vmem>>, vector<8x256xf32>,
    %c255_i32 = arith.constant 255 : i32
    %23 = tpu.dynamic_rotate %1 by %c255_i32 dim 1 : vector<8x256xf32>, i32 -> vector<8x256xf32>
    %c5 = arith.constant 5 : index
    %c0_13 = arith.constant 0 : index
    %24 = vector.load %arg2[%c5, %c0_13] : memref<9x256xf32, #tpu.memory_space<vmem>>, vector<1x256xf32>
    %25 = vector.broadcast %24 : vector<1x256xf32> to vector<8x256xf32>
    %26 = arith.mulf %23, %25 : vector<8x256xf32>
    %c40 = arith.constant 40 : index
    %c0_14 = arith.constant 0 : index
    %27 = vector.load %arg10[%c40, %c0_14] : memref<72x256xf32, #tpu.memory_space<vmem>>, vector<8x256xf32>
    tpu.vector_store %arg10[%c40, %c0_14], %26 {strides = array<i32>} : memref<72x256xf32, #tpu.memory_space<vmem>>, vector<8x256xf32>,
    %c241_i32 = arith.constant 241 : i32
    %28 = tpu.dynamic_rotate %1 by %c241_i32 dim 1 : vector<8x256xf32>, i32 -> vector<8x256xf32>
    %c6 = arith.constant 6 : index
    %c0_15 = arith.constant 0 : index
    %29 = vector.load %arg2[%c6, %c0_15] : memref<9x256xf32, #tpu.memory_space<vmem>>, vector<1x256xf32>
    %30 = vector.broadcast %29 : vector<1x256xf32> to vector<8x256xf32>
    %31 = arith.mulf %28, %30 : vector<8x256xf32>
    %c48 = arith.constant 48 : index
    %c0_16 = arith.constant 0 : index
    %32 = vector.load %arg10[%c48, %c0_16] : memref<72x256xf32, #tpu.memory_space<vmem>>, vector<8x256xf32>
    tpu.vector_store %arg10[%c48, %c0_16], %31 {strides = array<i32>} : memref<72x256xf32, #tpu.memory_space<vmem>>, vector<8x256xf32>,
    %c240_i32 = arith.constant 240 : i32
    %33 = tpu.dynamic_rotate %1 by %c240_i32 dim 1 : vector<8x256xf32>, i32 -> vector<8x256xf32>
    %c7 = arith.constant 7 : index
    %c0_17 = arith.constant 0 : index
    %34 = vector.load %arg2[%c7, %c0_17] : memref<9x256xf32, #tpu.memory_space<vmem>>, vector<1x256xf32>
    %35 = vector.broadcast %34 : vector<1x256xf32> to vector<8x256xf32>
    %36 = arith.mulf %33, %35 : vector<8x256xf32>
    %c56 = arith.constant 56 : index
    %c0_18 = arith.constant 0 : index
    %37 = vector.load %arg10[%c56, %c0_18] : memref<72x256xf32, #tpu.memory_space<vmem>>, vector<8x256xf32>
    tpu.vector_store %arg10[%c56, %c0_18], %36 {strides = array<i32>} : memref<72x256xf32, #tpu.memory_space<vmem>>, vector<8x256xf32>,
    %c239_i32 = arith.constant 239 : i32
    %38 = tpu.dynamic_rotate %1 by %c239_i32 dim 1 : vector<8x256xf32>, i32 -> vector<8x256xf32>
    %c8_19 = arith.constant 8 : index
    %c0_20 = arith.constant 0 : index
    %39 = vector.load %arg2[%c8_19, %c0_20] : memref<9x256xf32, #tpu.memory_space<vmem>>, vector<1x256xf32>
    %40 = vector.broadcast %39 : vector<1x256xf32> to vector<8x256xf32>
    %41 = arith.mulf %38, %40 : vector<8x256xf32>
    %c64 = arith.constant 64 : index
    %c0_21 = arith.constant 0 : index
    %42 = vector.load %arg10[%c64, %c0_21] : memref<72x256xf32, #tpu.memory_space<vmem>>, vector<8x256xf32>
    tpu.vector_store %arg10[%c64, %c0_21], %41 {strides = array<i32>} : memref<72x256xf32, #tpu.memory_space<vmem>>, vector<8x256xf32>,
    %c0_22 = arith.constant 0 : index
    %c0_23 = arith.constant 0 : index
    %43 = vector.load %arg3[%c0_22, %c0_23] : memref<8x72xf32, #tpu.memory_space<vmem>>, vector<8x72xf32>
    %c0_24 = arith.constant 0 : index
    %c0_25 = arith.constant 0 : index
    %44 = vector.load %arg10[%c0_24, %c0_25] : memref<72x256xf32, #tpu.memory_space<vmem>>, vector<72x256xf32>
    %cst = arith.constant dense<0.000000e+00> : vector<8x256xf32>
    %45 = tpu.matmul %43, %44, %cst {dimension_numbers = #tpu.dot_dimension_numbers<[1], [0], [0], [1], [0, 0, 1, 1], [], []>, precision = #tpu.contract_precision<fp32>} : vector<8x72xf32>, vector<72x256xf32>, vector<8x256xf32> -> vector<8x256xf32>
    %c0_26 = arith.constant 0 : index
    %c0_27 = arith.constant 0 : index
    %46 = vector.load %arg5[%c0_26, %c0_27] : memref<8x1xf32, #tpu.memory_space<vmem>>, vector<8x1xf32>
    %c0_28 = arith.constant 0 : index
    %c0_29 = arith.constant 0 : index
    %47 = vector.load %arg6[%c0_28, %c0_29] : memref<8x1xf32, #tpu.memory_space<vmem>>, vector<8x1xf32>
    %cst_30 = arith.constant dense<0.000000e+00> : vector<8xf32>
    %48 = vector.multi_reduction <add>, %45, %cst_30 [1] : vector<8x256xf32> to vector<8xf32>
    %49 = vector.shape_cast %48 : vector<8xf32> to vector<8x1xf32>
    %cst_31 = arith.constant 3.906250e-03 : f32
    %50 = vector.broadcast %cst_31 : f32 to vector<8x1xf32>
    %51 = arith.mulf %49, %50 : vector<8x1xf32>
    %52 = vector.broadcast %51 : vector<8x1xf32> to vector<8x256xf32>
    %53 = arith.subf %45, %52 : vector<8x256xf32>
    %54 = arith.mulf %53, %53 : vector<8x256xf32>
    %cst_32 = arith.constant dense<0.000000e+00> : vector<8xf32>
    %55 = vector.multi_reduction <add>, %54, %cst_32 [1] : vector<8x256xf32> to vector<8xf32>
    %56 = vector.shape_cast %55 : vector<8xf32> to vector<8x1xf32>
    %cst_33 = arith.constant 3.906250e-03 : f32
    %57 = vector.broadcast %cst_33 : f32 to vector<8x1xf32>
    %58 = arith.mulf %56, %57 : vector<8x1xf32>
    %cst_34 = arith.constant 9.99999974E-6 : f32
    %59 = vector.broadcast %cst_34 : f32 to vector<8x1xf32>
    %60 = arith.addf %58, %59 : vector<8x1xf32>
    %61 = math.rsqrt %60 : vector<8x1xf32>
    %62 = vector.broadcast %61 : vector<8x1xf32> to vector<8x256xf32>
    %63 = arith.mulf %53, %62 : vector<8x256xf32>
    %64 = vector.broadcast %46 : vector<8x1xf32> to vector<8x256xf32>
    %65 = arith.mulf %63, %64 : vector<8x256xf32>
    %66 = vector.broadcast %47 : vector<8x1xf32> to vector<8x256xf32>
    %67 = arith.addf %65, %66 : vector<8x256xf32>
    %cst_35 = arith.constant 0.000000e+00 : f32
    %68 = vector.broadcast %cst_35 : f32 to vector<8x256xf32>
    %69 = arith.maximumf %67, %68 : vector<8x256xf32>
    %c17_i32_36 = arith.constant 17 : i32
    %70 = tpu.dynamic_rotate %69 by %c17_i32_36 dim 1 : vector<8x256xf32>, i32 -> vector<8x256xf32>
    %c0_37 = arith.constant 0 : index
    %c0_38 = arith.constant 0 : index
    %71 = vector.load %arg2[%c0_37, %c0_38] : memref<9x256xf32, #tpu.memory_space<vmem>>, vector<1x256xf32>
    %72 = vector.broadcast %71 : vector<1x256xf32> to vector<8x256xf32>
    %73 = arith.mulf %70, %72 : vector<8x256xf32>
    %c0_39 = arith.constant 0 : index
    %c0_40 = arith.constant 0 : index
    %74 = vector.load %arg10[%c0_39, %c0_40] : memref<72x256xf32, #tpu.memory_space<vmem>>, vector<8x256xf32>
    tpu.vector_store %arg10[%c0_39, %c0_40], %73 {strides = array<i32>} : memref<72x256xf32, #tpu.memory_space<vmem>>, vector<8x256xf32>,
    %c16_i32_41 = arith.constant 16 : i32
    %75 = tpu.dynamic_rotate %69 by %c16_i32_41 dim 1 : vector<8x256xf32>, i32 -> vector<8x256xf32>
    %c1_42 = arith.constant 1 : index
    %c0_43 = arith.constant 0 : index
    %76 = vector.load %arg2[%c1_42, %c0_43] : memref<9x256xf32, #tpu.memory_space<vmem>>, vector<1x256xf32>
    %77 = vector.broadcast %76 : vector<1x256xf32> to vector<8x256xf32>
    %78 = arith.mulf %75, %77 : vector<8x256xf32>
    %c8_44 = arith.constant 8 : index
    %c0_45 = arith.constant 0 : index
    %79 = vector.load %arg10[%c8_44, %c0_45] : memref<72x256xf32, #tpu.memory_space<vmem>>, vector<8x256xf32>
    tpu.vector_store %arg10[%c8_44, %c0_45], %78 {strides = array<i32>} : memref<72x256xf32, #tpu.memory_space<vmem>>, vector<8x256xf32>,
    %c15_i32_46 = arith.constant 15 : i32
    %80 = tpu.dynamic_rotate %69 by %c15_i32_46 dim 1 : vector<8x256xf32>, i32 -> vector<8x256xf32>
    %c2_47 = arith.constant 2 : index
    %c0_48 = arith.constant 0 : index
    %81 = vector.load %arg2[%c2_47, %c0_48] : memref<9x256xf32, #tpu.memory_space<vmem>>, vector<1x256xf32>
    %82 = vector.broadcast %81 : vector<1x256xf32> to vector<8x256xf32>
    %83 = arith.mulf %80, %82 : vector<8x256xf32>
    %c16_49 = arith.constant 16 : index
    %c0_50 = arith.constant 0 : index
    %84 = vector.load %arg10[%c16_49, %c0_50] : memref<72x256xf32, #tpu.memory_space<vmem>>, vector<8x256xf32>
    tpu.vector_store %arg10[%c16_49, %c0_50], %83 {strides = array<i32>} : memref<72x256xf32, #tpu.memory_space<vmem>>, vector<8x256xf32>,
    %c1_i32_51 = arith.constant 1 : i32
    %85 = tpu.dynamic_rotate %69 by %c1_i32_51 dim 1 : vector<8x256xf32>, i32 -> vector<8x256xf32>
    %c3_52 = arith.constant 3 : index
    %c0_53 = arith.constant 0 : index
    %86 = vector.load %arg2[%c3_52, %c0_53] : memref<9x256xf32, #tpu.memory_space<vmem>>, vector<1x256xf32>
    %87 = vector.broadcast %86 : vector<1x256xf32> to vector<8x256xf32>
    %88 = arith.mulf %85, %87 : vector<8x256xf32>
    %c24_54 = arith.constant 24 : index
    %c0_55 = arith.constant 0 : index
    %89 = vector.load %arg10[%c24_54, %c0_55] : memref<72x256xf32, #tpu.memory_space<vmem>>, vector<8x256xf32>
    tpu.vector_store %arg10[%c24_54, %c0_55], %88 {strides = array<i32>} : memref<72x256xf32, #tpu.memory_space<vmem>>, vector<8x256xf32>,
    %c32_56 = arith.constant 32 : index
    %c0_57 = arith.constant 0 : index
    %90 = vector.load %arg10[%c32_56, %c0_57] : memref<72x256xf32, #tpu.memory_space<vmem>>, vector<8x256xf32>
    tpu.vector_store %arg10[%c32_56, %c0_57], %69 {strides = array<i32>} : memref<72x256xf32, #tpu.memory_space<vmem>>, vector<8x256xf32>,
    %c255_i32_58 = arith.constant 255 : i32
    %91 = tpu.dynamic_rotate %69 by %c255_i32_58 dim 1 : vector<8x256xf32>, i32 -> vector<8x256xf32>
    %c5_59 = arith.constant 5 : index
    %c0_60 = arith.constant 0 : index
    %92 = vector.load %arg2[%c5_59, %c0_60] : memref<9x256xf32, #tpu.memory_space<vmem>>, vector<1x256xf32>
    %93 = vector.broadcast %92 : vector<1x256xf32> to vector<8x256xf32>
    %94 = arith.mulf %91, %93 : vector<8x256xf32>
    %c40_61 = arith.constant 40 : index
    %c0_62 = arith.constant 0 : index
    %95 = vector.load %arg10[%c40_61, %c0_62] : memref<72x256xf32, #tpu.memory_space<vmem>>, vector<8x256xf32>
    tpu.vector_store %arg10[%c40_61, %c0_62], %94 {strides = array<i32>} : memref<72x256xf32, #tpu.memory_space<vmem>>, vector<8x256xf32>,
    %c241_i32_63 = arith.constant 241 : i32
    %96 = tpu.dynamic_rotate %69 by %c241_i32_63 dim 1 : vector<8x256xf32>, i32 -> vector<8x256xf32>
    %c6_64 = arith.constant 6 : index
    %c0_65 = arith.constant 0 : index
    %97 = vector.load %arg2[%c6_64, %c0_65] : memref<9x256xf32, #tpu.memory_space<vmem>>, vector<1x256xf32>
    %98 = vector.broadcast %97 : vector<1x256xf32> to vector<8x256xf32>
    %99 = arith.mulf %96, %98 : vector<8x256xf32>
    %c48_66 = arith.constant 48 : index
    %c0_67 = arith.constant 0 : index
    %100 = vector.load %arg10[%c48_66, %c0_67] : memref<72x256xf32, #tpu.memory_space<vmem>>, vector<8x256xf32>
    tpu.vector_store %arg10[%c48_66, %c0_67], %99 {strides = array<i32>} : memref<72x256xf32, #tpu.memory_space<vmem>>, vector<8x256xf32>,
    %c240_i32_68 = arith.constant 240 : i32
    %101 = tpu.dynamic_rotate %69 by %c240_i32_68 dim 1 : vector<8x256xf32>, i32 -> vector<8x256xf32>
    %c7_69 = arith.constant 7 : index
    %c0_70 = arith.constant 0 : index
    %102 = vector.load %arg2[%c7_69, %c0_70] : memref<9x256xf32, #tpu.memory_space<vmem>>, vector<1x256xf32>
    %103 = vector.broadcast %102 : vector<1x256xf32> to vector<8x256xf32>
    %104 = arith.mulf %101, %103 : vector<8x256xf32>
    %c56_71 = arith.constant 56 : index
    %c0_72 = arith.constant 0 : index
    %105 = vector.load %arg10[%c56_71, %c0_72] : memref<72x256xf32, #tpu.memory_space<vmem>>, vector<8x256xf32>
    tpu.vector_store %arg10[%c56_71, %c0_72], %104 {strides = array<i32>} : memref<72x256xf32, #tpu.memory_space<vmem>>, vector<8x256xf32>,
    %c239_i32_73 = arith.constant 239 : i32
    %106 = tpu.dynamic_rotate %69 by %c239_i32_73 dim 1 : vector<8x256xf32>, i32 -> vector<8x256xf32>
    %c8_74 = arith.constant 8 : index
    %c0_75 = arith.constant 0 : index
    %107 = vector.load %arg2[%c8_74, %c0_75] : memref<9x256xf32, #tpu.memory_space<vmem>>, vector<1x256xf32>
    %108 = vector.broadcast %107 : vector<1x256xf32> to vector<8x256xf32>
    %109 = arith.mulf %106, %108 : vector<8x256xf32>
    %c64_76 = arith.constant 64 : index
    %c0_77 = arith.constant 0 : index
    %110 = vector.load %arg10[%c64_76, %c0_77] : memref<72x256xf32, #tpu.memory_space<vmem>>, vector<8x256xf32>
    tpu.vector_store %arg10[%c64_76, %c0_77], %109 {strides = array<i32>} : memref<72x256xf32, #tpu.memory_space<vmem>>, vector<8x256xf32>,
    %c0_78 = arith.constant 0 : index
    %c0_79 = arith.constant 0 : index
    %111 = vector.load %arg4[%c0_78, %c0_79] : memref<8x72xf32, #tpu.memory_space<vmem>>, vector<8x72xf32>
    %c0_80 = arith.constant 0 : index
    %c0_81 = arith.constant 0 : index
    %112 = vector.load %arg10[%c0_80, %c0_81] : memref<72x256xf32, #tpu.memory_space<vmem>>, vector<72x256xf32>
    %cst_82 = arith.constant dense<0.000000e+00> : vector<8x256xf32>
    %113 = tpu.matmul %111, %112, %cst_82 {dimension_numbers = #tpu.dot_dimension_numbers<[1], [0], [0], [1], [0, 0, 1, 1], [], []>, precision = #tpu.contract_precision<fp32>} : vector<8x72xf32>, vector<72x256xf32>, vector<8x256xf32> -> vector<8x256xf32>
    %c0_83 = arith.constant 0 : index
    %c0_84 = arith.constant 0 : index
    %114 = vector.load %arg7[%c0_83, %c0_84] : memref<8x1xf32, #tpu.memory_space<vmem>>, vector<8x1xf32>
    %c0_85 = arith.constant 0 : index
    %c0_86 = arith.constant 0 : index
    %115 = vector.load %arg8[%c0_85, %c0_86] : memref<8x1xf32, #tpu.memory_space<vmem>>, vector<8x1xf32>
    %cst_87 = arith.constant dense<0.000000e+00> : vector<8xf32>
    %116 = vector.multi_reduction <add>, %113, %cst_87 [1] : vector<8x256xf32> to vector<8xf32>
    %117 = vector.shape_cast %116 : vector<8xf32> to vector<8x1xf32>
    %cst_88 = arith.constant 3.906250e-03 : f32
    %118 = vector.broadcast %cst_88 : f32 to vector<8x1xf32>
    %119 = arith.mulf %117, %118 : vector<8x1xf32>
    %120 = vector.broadcast %119 : vector<8x1xf32> to vector<8x256xf32>
    %121 = arith.subf %113, %120 : vector<8x256xf32>
    %122 = arith.mulf %121, %121 : vector<8x256xf32>
    %cst_89 = arith.constant dense<0.000000e+00> : vector<8xf32>
    %123 = vector.multi_reduction <add>, %122, %cst_89 [1] : vector<8x256xf32> to vector<8xf32>
    %124 = vector.shape_cast %123 : vector<8xf32> to vector<8x1xf32>
    %cst_90 = arith.constant 3.906250e-03 : f32
    %125 = vector.broadcast %cst_90 : f32 to vector<8x1xf32>
    %126 = arith.mulf %124, %125 : vector<8x1xf32>
    %cst_91 = arith.constant 9.99999974E-6 : f32
    %127 = vector.broadcast %cst_91 : f32 to vector<8x1xf32>
    %128 = arith.addf %126, %127 : vector<8x1xf32>
    %129 = math.rsqrt %128 : vector<8x1xf32>
    %130 = vector.broadcast %129 : vector<8x1xf32> to vector<8x256xf32>
    %131 = arith.mulf %121, %130 : vector<8x256xf32>
    %132 = vector.broadcast %114 : vector<8x1xf32> to vector<8x256xf32>
    %133 = arith.mulf %131, %132 : vector<8x256xf32>
    %134 = vector.broadcast %115 : vector<8x1xf32> to vector<8x256xf32>
    %135 = arith.addf %133, %134 : vector<8x256xf32>
    %136 = arith.addf %1, %135 : vector<8x256xf32>
    %c0_92 = arith.constant 0 : index
    %c0_93 = arith.constant 0 : index
    %c0_94 = arith.constant 0 : index
    %137 = vector.load %arg9[%c0_92, %c0_93, %c0_94] : memref<1x8x256xf32, #tpu.memory_space<vmem>>, vector<1x8x256xf32>
    %138 = vector.shape_cast %137 : vector<1x8x256xf32> to vector<8x256xf32>
    %139 = vector.shape_cast %136 : vector<8x256xf32> to vector<1x8x256xf32>
    tpu.vector_store %arg9[%c0_92, %c0_93, %c0_94], %139 {strides = array<i32>} : memref<1x8x256xf32, #tpu.memory_space<vmem>>, vector<1x8x256xf32>,
    return
  }
  func.func @transform_0(%arg0: i32) -> (i32, i32, i32) {
    %c0_i32 = arith.constant 0 : i32
    %c0_i32_0 = arith.constant 0 : i32
    %c0_i32_1 = arith.constant 0 : i32
    return %arg0, %c0_i32, %c0_i32_0 : i32, i32, i32
  }
  func.func @transform_1(%arg0: i32) -> (i32, i32) {
    %c0_i32 = arith.constant 0 : i32
    %c0_i32_0 = arith.constant 0 : i32
    %c0_i32_1 = arith.constant 0 : i32
    return %c0_i32, %c0_i32_0 : i32, i32
  }
  func.func @transform_2(%arg0: i32) -> (i32, i32) {
    %c0_i32 = arith.constant 0 : i32
    %c0_i32_0 = arith.constant 0 : i32
    %c0_i32_1 = arith.constant 0 : i32
    return %c0_i32, %c0_i32_0 : i32, i32
  }
  func.func @transform_3(%arg0: i32) -> (i32, i32) {
    %c0_i32 = arith.constant 0 : i32
    %c0_i32_0 = arith.constant 0 : i32
    %c0_i32_1 = arith.constant 0 : i32
    return %c0_i32, %c0_i32_0 : i32, i32
  }
  func.func @transform_4(%arg0: i32) -> (i32, i32) {
    %c0_i32 = arith.constant 0 : i32
    %c0_i32_0 = arith.constant 0 : i32
    %c0_i32_1 = arith.constant 0 : i32
    return %c0_i32, %c0_i32_0 : i32, i32
  }
  func.func @transform_5(%arg0: i32) -> (i32, i32) {
    %c0_i32 = arith.constant 0 : i32
    %c0_i32_0 = arith.constant 0 : i32
    %c0_i32_1 = arith.constant 0 : i32
    return %c0_i32, %c0_i32_0 : i32, i32
  }
  func.func @transform_6(%arg0: i32) -> (i32, i32) {
    %c0_i32 = arith.constant 0 : i32
    %c0_i32_0 = arith.constant 0 : i32
    %c0_i32_1 = arith.constant 0 : i32
    return %c0_i32, %c0_i32_0 : i32, i32
  }
  func.func @transform_7(%arg0: i32) -> (i32, i32) {
    %c0_i32 = arith.constant 0 : i32
    %c0_i32_0 = arith.constant 0 : i32
    %c0_i32_1 = arith.constant 0 : i32
    return %c0_i32, %c0_i32_0 : i32, i32
  }
  func.func @transform_8(%arg0: i32) -> (i32, i32, i32) {
    %c0_i32 = arith.constant 0 : i32
    %c0_i32_0 = arith.constant 0 : i32
    %c0_i32_1 = arith.constant 0 : i32
    return %arg0, %c0_i32, %c0_i32_0 : i32, i32, i32
  }
}

</mosaic_0001>

<bundles_post_ra>
// kernel: tpu_custom_call.1
= control target key start
LH: loop header
LB: loop body
LE: loop exit
PB: predicated region body
PF: predicated region fallthrough
CT: control target
= control target key end

     0   :  { %13 = vsyncpa [#allocation4], 0  ;;  %s2454_s0 = inlined_call_operand.vmem [shape: f32[1,8,256], index: 0, kind: input, shape index: {}]   ;;  %s2455_s1 = inlined_call_operand.hbm [shape: f32[9,256], index: 1, kind: input, shape index: {}]   ;;  %s2456_s2 = inlined_call_operand.vmem [shape: f32[8,72], index: 2, kind: input, shape index: {}]   ;;  %s2457_s3 = inlined_call_operand.vmem [shape: f32[8,72], index: 3, kind: input, shape index: {}]   ;;  %s2458_s4 = inlined_call_operand.vmem [shape: f32[8,1], index: 4, kind: input, shape index: {}]   ;;  %s2459_s5 = inlined_call_operand.vmem [shape: f32[8,1], index: 5, kind: input, shape index: {}]   ;;  %s2460_s6 = inlined_call_operand.vmem [shape: f32[8,1], index: 6, kind: input, shape index: {}]   ;;  %s2461_s7 = inlined_call_operand.vmem [shape: f32[8,1], index: 7, kind: input, shape index: {}]   ;;  %s2462_s8 = inlined_call_operand.hbm [shape: f32[1,8,256], index: 8, kind: output, shape index: {}]  }
   0x1   :  { %14 = vsyncpa [#allocation5], 0  ;;  %s21_s29 = sshll.u32 %s2455_s1, 4  ;;  %s1546_s30 = smov [#allocation3]   ;;  %s22_s29 = int_to_ptr.hbm [resolvable:$true] %s21_s29 }
   0x2   :  { %s23_s9 = sshll.u32 %s1546_s30, 4  ;;  %s1547_s10 = smov 256   ;;  %s24_s9 = int_to_ptr.vmem [resolvable:$true] %s23_s9 }
   0x3   :  { %s1548_s11 = smov 16  }
   0x4   :  { %29 = dma.hbm_to_vmem [thread:$0]  %s22_s29, 512, %s24_s9, [#allocation4], %s1547_s10, %s1547_s10, %s1548_s11  }
   0x5   :  { %1542 = dma.done.wait [#allocation4], 512  }
   0x6   :  { %1543 = vsyncadd [#allocation4], 4294966784  ;;  %v1610_v0 = vld [vmem:[%s2454_s0] sm:$0xff]  ;;  %s1549_s14 = smov 112   ;;  %s1550_s1 = smov 111   ;;  %v1621_v1 = vld [vmem:[%s2454_s0 + $0x8] sm:$0xff]  ;;  %v52_v3 = vlaneseq }
   0x7   :  { %159 = vrot.lane.b32.xlu1 %v1610_v0, %s1549_s14  ;;  %177 = vrot.lane.b32.xlu0 %v1610_v0, %s1550_s1  ;;  %s1551_s15 = smov 113   ;;  %s1552_s18 = smov 127   ;;  %v1651_v5 = vld [vmem:[#allocation3 + $0x6] ss:$8 sm:$0x3]  ;;  %v1686_v28 = vand.u32 4294901760, %v1610_v0 }
   0x8   :  { %141 = vrot.lane.b32.xlu2 %v1610_v0, %s1551_s15  ;;  %s1553_s19 = smov 1   ;;  %s1554_s20 = smov 15   ;;  %v1649_v4 = vand.u32 127, %v52_v3  ;;  %v151_v9 = vperm.slane %v1651_v5, 0  ;;  %v152_v42 = vperm.slane %v1651_v5, 1  ;;  %vm214_vm6 = vcmask 588800  }
   0x9   :  { %s1555_s21 = smov 17   ;;  %v1659_v11 = vld [vmem:[#allocation3 + $0x7] ss:$8 sm:$0x3]  ;;  %v1711_v38 = vsub.f32 %v1610_v0, %v1686_v28  ;;  %s1465_s10 = sshll.u32 %s2462_s8, 4  ;;  %s1466_s10 = int_to_ptr.hbm [resolvable:$true] %s1465_s10 }
   0xa   :  { %vm145_vm0 = vcmp.lt.s32.totalorder %v1649_v4, 113  ;;  %v1661_v12 = vld [vmem:[#allocation3 + $0x10] ss:$8 sm:$0x3]  ;;  %vm163_vm1 = vcmp.lt.s32.totalorder %v1649_v4, 112  ;;  %v169_v14 = vperm.slane %v1659_v11, 0 }
   0xb   :  { %vm181_vm2 = vcmp.lt.s32.totalorder %v1649_v4, 111  ;;  %v187_v15 = vperm.slane %v1661_v12, 0  ;;  %v1674_v23 = vld [vmem:[#allocation3 + $0x5] ss:$8 sm:$0x3]  ;;  %vm127_vm3 = vcmp.lt.s32.totalorder %v1649_v4, 127 }
   0xc   :  { %v133_v30 = vperm.slane %v1674_v23, 0  ;;  %v1718_v41 = vld [vmem:[#allocation3 + $0x3] ss:$8 sm:$0x3]  ;;  %v188_v43 = vperm.slane %v1661_v12, 1  ;;  %vm107_vm4 = vcmp.lt.s32.totalorder %v1649_v4, 1 }
   0xd   :  { %v1726_v45 = vld [vmem:[#allocation3 + $0x2] ss:$8 sm:$0x3]  ;;  %v113_v50 = vperm.slane %v1718_v41, 0  ;;  %vm89_vm5 = vcmp.lt.s32.totalorder %v1649_v4, 15  ;;  %v285_v51 = vand.u32 4294901760, %v1711_v38 }
   0xe   :  { %v95_v55 = vperm.slane %v1726_v45, 0  ;;  %v170_v58 = vperm.slane %v1659_v11, 1  ;;  %vm71_vm7 = vcmp.lt.s32.totalorder %v1649_v4, 16  ;;  %vm54_vm8 = vcmp.lt.s32.totalorder %v1649_v4, 17 }
   0xf   :  { %161 = vrot.lane.b32.xlu1 %v1621_v1, %s1549_s14  ;;  %179 = vrot.lane.b32.xlu0 %v1621_v1, %s1550_s1 }
  0x10   :  { %143 = vrot.lane.b32.xlu2 %v1621_v1, %s1551_s15 }
  0x17   :  { %125 = vrot.lane.b32.xlu1 %v1621_v1, %s1552_s18  ;;  %123 = vrot.lane.b32.xlu0 %v1610_v0, %s1552_s18 }
  0x18   :  { %103 = vrot.lane.b32.xlu2 %v1610_v0, %s1553_s19 }
  0x1f   :  { %85 = vrot.lane.b32.xlu1 %v1610_v0, %s1554_s20  ;;  %105 = vrot.lane.b32.xlu0 %v1621_v1, %s1553_s19 }
  0x20   :  { %87 = vrot.lane.b32.xlu2 %v1621_v1, %s1554_s20 }
  0x27   :  { %69 = vrot.lane.b32.xlu1 %v1621_v1, %s1548_s11  ;;  %67 = vrot.lane.b32.xlu0 %v1610_v0, %s1548_s11 }
  0x28   :  { %48 = vrot.lane.b32.xlu2 %v1610_v0, %s1555_s21  ;;  %v195_v0 = vld [vmem:[%s2456_s2] sm:$0xff] }
  0x2f   :  { %50 = vrot.lane.b32.xlu0 %v1621_v1, %s1555_s21 }
  0x62   :  { %v142_v2 = vpop.permute.xlu2 %141 }
  0x6a   :  { %v144_v6 = vpop.permute.xlu2 %143 }
  0x6b   :  { %v146_v10 = vsel %vm145_vm0, %v142_v2, %v144_v6  ;;  %v147_v46 = vsel %vm145_vm0, %v144_v6, %v142_v2  ;;  %v286_v6 = vsub.f32 %v1711_v38, %v285_v51 }
  0x6c   :  { %v155_v13 = vmul.f32 %v151_v9, %v146_v10  ;;  %v156_v57 = vmul.f32 %v152_v42, %v147_v46  ;;  %v96_v42 = vperm.slane %v1726_v45, 1 }
  0x6e   :  { %v1667_v16 = vand.u32 4294901760, %v155_v13  ;;  %v1767_v10 = vand.u32 4294901760, %v156_v57 }
  0x70   :  { %v1683_v27 = vsub.f32 %v155_v13, %v1667_v16  ;;  %v1774_v13 = vld [vmem:[#allocation3 + $0x1] ss:$8 sm:$0x3] }
  0x72   :  { %v1680_v26 = vpop.permute.xlu2 %103  ;;  %v273_v35 = vand.u32 4294901760, %v1683_v27 }
  0x74   :  { %v274_v49 = vsub.f32 %v1683_v27, %v273_v35 }
  0x76   :  { %v275_v62 = vand.u32 4294901760, %v274_v49 }
  0x79   :  { %v1654_v7 = vpop.permute.xlu1 %159  ;;  %v178_v8 = vpop.permute.xlu0 %177 }
  0x7a   :  { %v88_v56 = vpop.permute.xlu2 %87 }
  0x81   :  { %v162_v17 = vpop.permute.xlu1 %161  ;;  %v180_v18 = vpop.permute.xlu0 %179 }
  0x82   :  { %v164_v19 = vsel %vm163_vm1, %v1654_v7, %v162_v17  ;;  %v182_v20 = vsel %vm181_vm2, %v178_v8, %v180_v18  ;;  %v183_v52 = vsel %vm181_vm2, %v180_v18, %v178_v8  ;;  %v165_v59 = vsel %vm163_vm1, %v162_v17, %v1654_v7 }
  0x83   :  { %v173_v21 = vmul.f32 %v169_v14, %v164_v19  ;;  %v191_v22 = vmul.f32 %v187_v15, %v182_v20  ;;  %v192_v2 = vmul.f32 %v188_v43, %v183_v52  ;;  %v134_v7 = vperm.slane %v1674_v23, 1 }
  0x84   :  { %v174_v11 = vmul.f32 %v170_v58, %v165_v59  ;;  %v216_v14 = vsel %vm214_vm6, %v195_v0, 0  ;;  %v57_v59 = vld [vmem:[#allocation3] ss:$8 sm:$0x3] }
  0x85   :  { %v1676_v24 = vand.u32 4294901760, %v173_v21  ;;  %v1678_v25 = vand.u32 4294901760, %v191_v22  ;;  %v1784_v19 = vand.u32 4294901760, %v192_v2 }
  0x87   :  { %226 = vmatpush.msra.mxu0 %v1678_v25  ;;  %366 = vmatpush.msra.mxu3 %v1678_v25  ;;  %v1691_v29 = vsub.f32 %v191_v22, %v1678_v25  ;;  %v1696_v31 = vsub.f32 %v173_v21, %v1676_v24  ;;  %v287_v21 = vand.u32 4294901760, %v286_v6  ;;  %v77_v22 = vperm.slane %v1774_v13, 0 }
  0x88   :  { %v1810_v49 = vsub.f32 %v192_v2, %v1784_v19 }
  0x89   :  { %v1698_v32 = vpop.permute.xlu1 %125  ;;  %228 = vmatpush.msra.mxu0 %v1676_v24  ;;  %327 = vmatpush.msra.mxu2 %v1691_v29  ;;  %v124_v33 = vpop.permute.xlu0 %123  ;;  %v261_v34 = vand.u32 4294901760, %v1691_v29  ;;  %v267_v37 = vand.u32 4294901760, %v1696_v31 }
  0x8a   :  { %368 = vmatpush.msra.mxu3 %v1676_v24  ;;  %v128_v36 = vsel %vm127_vm3, %v124_v33, %v1698_v32  ;;  %v129_v15 = vsel %vm127_vm3, %v1698_v32, %v124_v33  ;;  %v1796_v32 = vsub.f32 %v156_v57, %v1767_v10  ;;  %v1798_v33 = vand.u32 4294901760, %v174_v11 }
  0x8b   :  { %v137_v39 = vmul.f32 %v133_v30, %v128_v36  ;;  %230 = vmatpush.msra.mxu0 %v1667_v16  ;;  %330 = vmatpush.msra.mxu2 %v1696_v31  ;;  %v262_v40 = vsub.f32 %v1691_v29, %v261_v34  ;;  %v268_v44 = vsub.f32 %v1696_v31, %v267_v37  ;;  %v1793_v30 = vand.u32 4294901760, %v216_v14 }
  0x8c   :  { %370 = vmatpush.msra.mxu3 %v1667_v16  ;;  %v138_v36 = vmul.f32 %v134_v7, %v129_v15  ;;  %v1829_v57 = vsub.f32 %v174_v11, %v1798_v33  ;;  %v511_v6 = vand.u32 4294901760, %v1810_v49  ;;  %v49_v7 = vpop.permute.xlu2 %48 }
  0x8d   :  { %v1730_v47 = vand.u32 4294901760, %v137_v39  ;;  %333 = vmatpush.msra.mxu2 %v1683_v27  ;;  %v263_v48 = vand.u32 4294901760, %v262_v40  ;;  %v269_v53 = vand.u32 4294901760, %v268_v44  ;;  %v114_v40 = vperm.slane %v1718_v41, 1 }
  0x8e   :  { %v78_v44 = vperm.slane %v1774_v13, 1  ;;  %v1831_v58 = vand.u32 4294901760, %v138_v36 }
  0x8f   :  { %232 = vmatpush.msra.mxu0 %v1730_v47  ;;  %264 = vmatpush.msra.mxu1 %v263_v48  ;;  %v1744_v54 = vsub.f32 %v137_v39, %v1730_v47 }
  0x90   :  { %372 = vmatpush.msra.mxu3 %v1730_v47  ;;  %v1853_v13 = vsub.f32 %v138_v36, %v1831_v58  ;;  %v523_v36 = vand.u32 4294901760, %v1796_v32 }
  0x91   :  { %v86_v60 = vpop.permute.xlu1 %85  ;;  %270 = vmatpush.msra.mxu1 %v269_v53  ;;  %336 = vmatpush.msra.mxu2 %v1744_v54  ;;  %v106_v61 = vpop.permute.xlu0 %105  ;;  %v279_v63 = vand.u32 4294901760, %v1744_v54 }
  0x92   :  { %v109_v3 = vsel %vm107_vm4, %v106_v61, %v1680_v26  ;;  %v91_v5 = vsel %vm89_vm5, %v88_v56, %v86_v60  ;;  %234 = vmatpush.msra.mxu0 %v1686_v28  ;;  %374 = vmatpush.msra.mxu3 %v1686_v28  ;;  %v90_v52 = vsel %vm89_vm5, %v86_v60, %v88_v56  ;;  %v1837_v60 = vand.u32 4294901760, %v1621_v1 }
  0x93   :  { %v117_v8 = vmul.f32 %v113_v50, %v109_v3  ;;  %v99_v9 = vmul.f32 %v95_v55, %v91_v5  ;;  %276 = vmatpush.msra.mxu1 %v275_v62  ;;  %v280_v12 = vsub.f32 %v1744_v54, %v279_v63  ;;  %339 = vmatpush.msra.mxu2 %v1711_v38 }
  0x94   :  { %v108_v50 = vsel %vm107_vm4, %v1680_v26, %v106_v61  ;;  %v1826_v26 = vsub.f32 %v216_v14, %v1793_v30  ;;  %v100_v2 = vmul.f32 %v96_v42, %v90_v52  ;;  %v517_v14 = vand.u32 4294901760, %v1829_v57 }
  0x95   :  { %v1780_v17 = vand.u32 4294901760, %v117_v8  ;;  %v1782_v18 = vand.u32 4294901760, %v99_v9  ;;  %v281_v20 = vand.u32 4294901760, %v280_v12  ;;  %v118_v61 = vmul.f32 %v114_v40, %v108_v50 }
  0x96   :  { %v1850_v12 = vand.u32 4294901760, %v1826_v26  ;;  %v1859_v15 = vsub.f32 %v1621_v1, %v1837_v60  ;;  %v1866_v42 = vand.u32 4294901760, %v100_v2 }
  0x97   :  { %236 = vmatpush.msra.mxu0 %v1780_v17  ;;  %376 = vmatpush.msra.mxu3 %v1780_v17  ;;  %v1791_v23 = vsub.f32 %v117_v8, %v1780_v17  ;;  %v1801_v39 = vsub.f32 %v99_v9, %v1782_v18  ;;  %v59_v8 = vperm.slane %v57_v59, 0  ;;  %v60_v9 = vperm.slane %v57_v59, 1 }
  0x98   :  { %282 = vmatpush.msra.mxu1 %v281_v20  ;;  %v1861_v20 = vand.u32 4294901760, %v118_v61  ;;  %v246_v52 = vsub.f32 %v1826_v26, %v1850_v12  ;;  %v535_v59 = vand.u32 4294901760, %v1859_v15 }
  0x99   :  { %v70_v43 = vpop.permute.xlu1 %69  ;;  %v68_v46 = vpop.permute.xlu0 %67  ;;  %342 = vmatpush.msra.mxu2 %v1791_v23  ;;  %238 = vmatpush.msra.mxu0 %v1782_v18  ;;  %v291_v48 = vand.u32 4294901760, %v1791_v23  ;;  %v297_v45 = vand.u32 4294901760, %v1801_v39 }
  0x9a   :  { %v73_v41 = vsel %vm71_vm7, %v70_v43, %v68_v46  ;;  %288 = vmatpush.msra.mxu1 %v287_v21  ;;  %378 = vmatpush.msra.mxu3 %v1782_v18  ;;  %v72_v3 = vsel %vm71_vm7, %v68_v46, %v70_v43 }
  0x9b   :  { %v81_v53 = vmul.f32 %v77_v22, %v73_v41  ;;  %345 = vmatpush.msra.mxu2 %v1801_v39  ;;  %v292_v55 = vsub.f32 %v1791_v23, %v291_v48  ;;  %v298_v56 = vsub.f32 %v1801_v39, %v297_v45  ;;  %v82_v21 = vmul.f32 %v78_v44, %v72_v3 }
  0x9c   :  { %v512_v44 = vsub.f32 %v1810_v49, %v511_v6 }
  0x9d   :  { %v1839_v62 = vand.u32 4294901760, %v81_v53  ;;  %v293_v0 = vand.u32 4294901760, %v292_v55  ;;  %v299_v5 = vand.u32 4294901760, %v298_v56  ;;  %v529_v55 = vand.u32 4294901760, %v1853_v13 }
  0x9e   :  { %v1886_v56 = vsub.f32 %v118_v61, %v1861_v20 }
  0x9f   :  { %240 = vmatpush.msra.mxu0 %v1839_v62  ;;  %294 = vmatpush.msra.mxu1 %v293_v0  ;;  %v1847_v11 = vsub.f32 %v81_v53, %v1839_v62  ;;  %v518_v53 = vsub.f32 %v1829_v57, %v517_v14  ;;  %v1888_v0 = vand.u32 4294901760, %v82_v21 }
  0xa0   :  { %380 = vmatpush.msra.mxu3 %v1839_v62 }
  0xa1   :  { %v51_v22 = vpop.permute.xlu0 %50  ;;  %300 = vmatpush.msra.mxu1 %v299_v5  ;;  %348 = vmatpush.msra.mxu2 %v1847_v11  ;;  %v303_v40 = vand.u32 4294901760, %v1847_v11 }
  0xa2   :  { %v55_v43 = vsel %vm54_vm8, %v49_v7, %v51_v22  ;;  %v56_v1 = vsel %vm54_vm8, %v51_v22, %v49_v7  ;;  %v513_v7 = vand.u32 4294901760, %v512_v44  ;;  %v1911_v44 = vsub.f32 %v82_v21, %v1888_v0 }
  0xa3   :  { %v63_v46 = vmul.f32 %v59_v8, %v56_v1  ;;  %v64_v50 = vmul.f32 %v60_v9, %v55_v43  ;;  %v304_v41 = vsub.f32 %v1847_v11, %v303_v40  ;;  %v524_v8 = vsub.f32 %v1796_v32, %v523_v36 }
  0xa4   :  { %v1896_v9 = vsub.f32 %v100_v2, %v1866_v42  ;;  %v1902_v43 = vand.u32 4294901760, %v246_v52  ;;  %v519_v1 = vand.u32 4294901760, %v518_v53  ;;  %v536_v2 = vsub.f32 %v1859_v15, %v535_v59 }
  0xa5   :  { %v1890_v3 = vand.u32 4294901760, %v63_v46  ;;  %v305_v5 = vand.u32 4294901760, %v304_v41  ;;  %v1898_v22 = vand.u32 4294901760, %v64_v50  ;;  %v541_v52 = vand.u32 4294901760, %v1886_v56 }
  0xa6   :  { %v547_v53 = vand.u32 4294901760, %v1896_v9 }
  0xa7   :  { %242 = vmatpush.msra.mxu0 %v1890_v3  ;;  %306 = vmatpush.msra.mxu1 %v305_v5  ;;  %v308_v61 = vsub.f32 %v63_v46, %v1890_v3  ;;  %v530_v46 = vsub.f32 %v1853_v13, %v529_v55  ;;  %v1921_v29 = vsub.f32 %v64_v50, %v1898_v22  ;;  %v537_v5 = vand.u32 4294901760, %v536_v2 }
  0xa8   :  { %382 = vmatpush.msra.mxu3 %v1890_v3  ;;  %248 = vmatmul.f32.vlgmr.msra.gmra.mxu0 %v1902_v43  ;;  %v542_v50 = vsub.f32 %v1886_v56, %v541_v52  ;;  %v548_v27 = vsub.f32 %v1896_v9, %v547_v53 }
  0xa9   :  { %400 = vmatpush.msrb.mxu0 %v261_v34  ;;  %351 = vmatpush.msra.mxu2 %v308_v61  ;;  %v309_v41 = vand.u32 4294901760, %v308_v61  ;;  %v525_v34 = vand.u32 4294901760, %v524_v8  ;;  %v531_v31 = vand.u32 4294901760, %v530_v46 }
  0xaa   :  { %514 = vmatpush.msrb.mxu3 %v513_v7  ;;  %v553_v7 = vand.u32 4294901760, %v1911_v44  ;;  %354 = vmatmul.f32.vlgmr.msra.gmra.mxu2 %v1826_v26  ;;  %v543_v54 = vand.u32 4294901760, %v542_v50  ;;  %v549_v38 = vand.u32 4294901760, %v548_v27  ;;  %v1413_v50 = vld [vmem:[%s2460_s6] sm:$0xff] }
  0xab   :  { %404 = vmatpush.msrb.mxu0 %v267_v37  ;;  %476 = vmatpush.msrb.mxu2 %v1784_v19  ;;  %v310_v21 = vsub.f32 %v308_v61, %v309_v41  ;;  %v2072_v27 = vld [vmem:[#allocation3 + $0x7] ss:$8 sm:$0x3] }
  0xac   :  { %520 = vmatpush.msrb.mxu3 %v519_v1 }
  0xad   :  { %408 = vmatpush.msrb.mxu0 %v273_v35  ;;  %478 = vmatpush.msrb.mxu2 %v1798_v33  ;;  %v311_v37 = vand.u32 4294901760, %v310_v21  ;;  %v559_v35 = vand.u32 4294901760, %v1921_v29 }
  0xae   :  { %526 = vmatpush.msrb.mxu3 %v525_v34 }
  0xaf   :  { %412 = vmatpush.msrb.mxu0 %v279_v63  ;;  %480 = vmatpush.msrb.mxu2 %v1767_v10  ;;  %v554_v63 = vsub.f32 %v1911_v44, %v553_v7 }
  0xb0   :  { %532 = vmatpush.msrb.mxu3 %v531_v31  ;;  %312 = vmatpush.msra.mxu1 %v311_v37 }
  0xb1   :  { %416 = vmatpush.msrb.mxu0 %v285_v51  ;;  %482 = vmatpush.msrb.mxu2 %v1831_v58  ;;  %v555_v51 = vand.u32 4294901760, %v554_v63 }
  0xb2   :  { %446 = vmatpush.msrb.mxu1 %v1678_v25  ;;  %538 = vmatpush.msrb.mxu3 %v537_v5  ;;  %v560_v25 = vsub.f32 %v1921_v29, %v559_v35 }
  0xb3   :  { %420 = vmatpush.msrb.mxu0 %v291_v48  ;;  %484 = vmatpush.msrb.mxu2 %v1837_v60 }
  0xb4   :  { %448 = vmatpush.msrb.mxu1 %v1676_v24  ;;  %544 = vmatpush.msrb.mxu3 %v543_v54  ;;  %v561_v24 = vand.u32 4294901760, %v560_v25 }
  0xb5   :  { %424 = vmatpush.msrb.mxu0 %v297_v45  ;;  %486 = vmatpush.msrb.mxu2 %v1861_v20 }
  0xb6   :  { %450 = vmatpush.msrb.mxu1 %v1667_v16  ;;  %550 = vmatpush.msrb.mxu3 %v549_v38 }
  0xb7   :  { %428 = vmatpush.msrb.mxu0 %v303_v40  ;;  %488 = vmatpush.msrb.mxu2 %v1866_v42 }
  0xb8   :  { %452 = vmatpush.msrb.mxu1 %v1730_v47  ;;  %556 = vmatpush.msrb.mxu3 %v555_v51 }
  0xb9   :  { %432 = vmatpush.msrb.mxu0 %v309_v41  ;;  %490 = vmatpush.msrb.mxu2 %v1888_v0 }
  0xba   :  { %454 = vmatpush.msrb.mxu1 %v1686_v28  ;;  %562 = vmatpush.msrb.mxu3 %v561_v24  ;;  %v2083_v24 = vld [vmem:[#allocation3 + $0x10] ss:$8 sm:$0x3] }
  0xbb   :  { %386 = vmatmul.f32.vlgmr.msra.gmra.mxu3 %v1850_v12  ;;  %577 = vmatpush.msra.mxu0 %v1810_v49 }
  0xbc   :  { %696 = vmatpush.msra.mxu3 %v1784_v19  ;;  %456 = vmatpush.msrb.mxu1 %v1780_v17 }
  0xbd   :  { %492 = vmatpush.msrb.mxu2 %v1898_v22  ;;  %580 = vmatpush.msra.mxu0 %v1829_v57 }
  0xbe   :  { %698 = vmatpush.msra.mxu3 %v1798_v33  ;;  %458 = vmatpush.msrb.mxu1 %v1782_v18 }
  0xbf   :  { %650 = vmatpush.msra.mxu2 %v511_v6  ;;  %583 = vmatpush.msra.mxu0 %v1796_v32 }
  0xc0   :  { %700 = vmatpush.msra.mxu3 %v1767_v10  ;;  %460 = vmatpush.msrb.mxu1 %v1839_v62 }
  0xc1   :  { %654 = vmatpush.msra.mxu2 %v517_v14  ;;  %586 = vmatpush.msra.mxu0 %v1853_v13  ;;  %v718_v13 = vld [vmem:[%s2458_s4] sm:$0xff]  ;;  %v1556_v14 = vmov 0  }
  0xc2   :  { %314 = vmatmul.f32.vlgmr.msra.gmra.mxu1 %v1793_v30  ;;  %702 = vmatpush.msra.mxu3 %v1831_v58 }
  0xc3   :  { %658 = vmatpush.msra.mxu2 %v523_v36  ;;  %462 = vmatpush.msrb.mxu1 %v1890_v3 }
  0xc4   :  { %589 = vmatpush.msra.mxu0 %v1859_v15  ;;  %704 = vmatpush.msra.mxu3 %v1837_v60  ;;  %v719_v15 = vld [vmem:[%s2459_s5] sm:$0xff] }
  0xc5   :  { %616 = vmatpush.msra.mxu1 %v1784_v19  ;;  %662 = vmatpush.msra.mxu2 %v529_v55 }
  0xc6   :  { %592 = vmatpush.msra.mxu0 %v1886_v56  ;;  %706 = vmatpush.msra.mxu3 %v1861_v20 }
  0xc7   :  { %618 = vmatpush.msra.mxu1 %v1798_v33  ;;  %666 = vmatpush.msra.mxu2 %v535_v59 }
  0xc8   :  { %434 = vmatmul.f32.vlgmr.msrb.gmra.mxu0 %v1793_v30  ;;  %708 = vmatpush.msra.mxu3 %v1866_v42 }
  0xc9   :  { %620 = vmatpush.msra.mxu1 %v1767_v10  ;;  %595 = vmatpush.msra.mxu0 %v1896_v9 }
  0xca   :  { %670 = vmatpush.msra.mxu2 %v541_v52  ;;  %564 = vmatmul.f32.vlgmr.msrb.gmra.mxu3 %v1793_v30 }
  0xcb   :  { %498 = vmatmul.f32.vlgmr.msrb.gmra.mxu2 %v1902_v43  ;;  %464 = vmatmul.f32.vlgmr.msrb.gmra.mxu1 %v1793_v30 }
  0xcc   :  { %598 = vmatpush.msra.mxu0 %v1911_v44  ;;  %622 = vmatpush.msra.mxu1 %v1831_v58 }
  0xcd   :  { %674 = vmatpush.msra.mxu2 %v547_v53  ;;  %710 = vmatpush.msra.mxu3 %v1888_v0 }
  0xce   :  { %601 = vmatpush.msra.mxu0 %v1921_v29  ;;  %624 = vmatpush.msra.mxu1 %v1837_v60 }
  0xcf   :  { %678 = vmatpush.msra.mxu2 %v553_v7  ;;  %712 = vmatpush.msra.mxu3 %v1898_v22  ;;  %v1414_v7 = vld [vmem:[%s2461_s7] sm:$0xff] }
  0xd0   :  { %626 = vmatpush.msra.mxu1 %v1861_v20  ;;  %604 = vmatmul.f32.vlgmr.msra.gmra.mxu0 %v1826_v26 }
  0xd1   :  { %682 = vmatpush.msra.mxu2 %v559_v35  ;;  %1487 = vset.pattern.permute.xlu0 %v1556_v14  ;;  %v867_v35 = vperm.slane %v2072_v27, 0 }
  0xd2   :  { %628 = vmatpush.msra.mxu1 %v1866_v42  ;;  %714 = vmatmul.f32.vlgmr.msra.gmra.mxu3 %v1793_v30 }
  0xd3   :  { %684 = vmatmul.f32.vlgmr.msra.gmra.mxu2 %v1793_v30  ;;  %747 = vperm.xlu0 %1487, %v718_v13   ;;  %v2123_v13 = vld [vmem:[#allocation3 + $0x5] ss:$8 sm:$0x3] }
  0xd4   :  { %630 = vmatpush.msra.mxu1 %v1888_v0 }
  0xd6   :  { %632 = vmatpush.msra.mxu1 %v1898_v22 }
  0xd7   :  { %636 = vmatmul.f32.vlgmr.msra.gmra.mxu1 %v1850_v12 }
  0xdb   :  { %754 = vperm.xlu0 %1487, %v719_v15  }
 0x125   :  { %v249_v16 = vpop.f32.mrf.mxu0 }
 0x12d   :  { %v355_v10 = vpop.f32.mrf.mxu2 }
 0x13e   :  { %v387_v47 = vpop.f32.mrf.mxu3 }
 0x13f   :  { %v315_v28 = vpop.f32.mrf.mxu1 }
 0x140   :  { %v316_v18 = vadd.f32 %v315_v28, %v249_v16  ;;  %v883_v28 = vperm.slane %v2083_v24, 0 }
 0x142   :  { %v356_v23 = vadd.f32 %v355_v10, %v316_v18 }
 0x144   :  { %v388_v49 = vadd.f32 %v387_v47, %v356_v23 }
 0x145   :  { %v435_v17 = vpop.f32.mrf.mxu0  ;;  %v748_v1 = vpop.permute.xlu0 %747 }
 0x146   :  { %v436_v26 = vadd.f32 %v435_v17, %v388_v49 }
 0x148   :  { %v465_v19 = vpop.f32.mrf.mxu1 }
 0x149   :  { %v466_v6 = vadd.f32 %v465_v19, %v436_v26 }
 0x14d   :  { %v565_v33 = vpop.f32.mrf.mxu3  ;;  %v605_v48 = vpop.f32.mrf.mxu0 }
 0x14e   :  { %v499_v32 = vpop.f32.mrf.mxu2  ;;  %v755_v21 = vpop.permute.xlu0 %754 }
 0x14f   :  { %v566_v39 = vadd.f32 %v565_v33, %v499_v32 }
 0x151   :  { %v606_v30 = vadd.f32 %v605_v48, %v566_v39 }
 0x154   :  { %v637_v45 = vpop.f32.mrf.mxu1 }
 0x155   :  { %v638_v57 = vadd.f32 %v637_v45, %v606_v30  ;;  %v715_v60 = vpop.f32.mrf.mxu3  ;;  %v2114_v45 = vld [vmem:[#allocation3 + $0x6] ss:$8 sm:$0x3] }
 0x156   :  { %v685_v58 = vpop.f32.mrf.mxu2 }
 0x157   :  { %v686_v62 = vadd.f32 %v685_v58, %v638_v57 }
 0x159   :  { %v716_v11 = vadd.f32 %v715_v60, %v686_v62  ;;  %v851_v60 = vperm.slane %v2114_v45, 0 }
 0x15b   :  { %v720_v12 = vadd.f32 %v716_v11, %v466_v6 }
 0x15d   :  { %721 = vadd.xlane.f32.xlu1 %v720_v12  ;;  %v2121_v12 = vld [vmem:[#allocation3 + $0x2] ss:$8 sm:$0x3] }
 0x1d0   :  { %v722_v20 = vpop.xlane.xlu1 %721 }
 0x1d1   :  { %v723_v40 = vmul.f32 0.00390625, %v722_v20 }
 0x1d3   :  { %v724_v36 = vsub.f32 %v466_v6, %v723_v40  ;;  %v725_v42 = vsub.f32 %v716_v11, %v723_v40 }
 0x1d5   :  { %v726_v55 = vmul.f32 %v724_v36, %v724_v36  ;;  %v727_v59 = vmul.f32 %v725_v42, %v725_v42 }
 0x1d7   :  { %v728_v56 = vadd.f32 %v727_v59, %v726_v55  ;;  %v835_v55 = vperm.slane %v2123_v13, 0 }
 0x1d9   :  { %729 = vadd.xlane.f32.xlu2 %v728_v56 }
 0x24c   :  { %v730_v0 = vpop.xlane.xlu2 %729 }
 0x24d   :  { %v731_v3 = vmul.f32 0.00390625, %v730_v0 }
 0x24f   :  { %v732_v8 = vadd.f32 1e-05, %v731_v3 }
 0x251   :  { %1488 = vrsqrt.f32 %v732_v8  ;;  %vm739_vm10 = vweird.f32 %v732_v8 }
 0x257   :  { %v1489_v9 = vpop.eup %1488 }
 0x258   :  { %v734_v22 = vmul.f32 %v1489_v9, %v732_v8  ;;  %vm740_vm9 = vweird.f32 %v1489_v9 }
 0x259   :  { %vm741_vm11 = vmor %vm739_vm10, %vm740_vm9 }
 0x25a   :  { %v735_v61 = vmul.f32 %v1489_v9, %v734_v22 }
 0x25c   :  { %v736_v43 = vmul.f32 0.5, %v735_v61 }
 0x25e   :  { %v737_v2 = vsub.f32 1.5, %v736_v43  ;;  %v884_v43 = vperm.slane %v2083_v24, 1 }
 0x260   :  { %v738_v44 = vmul.f32 %v1489_v9, %v737_v2 }
 0x262   :  { %v742_v46 = vsel %vm741_vm11, %v1489_v9, %v738_v44 }
 0x263   :  { %v743_v41 = vmul.f32 %v742_v46, %v724_v36  ;;  %v744_v52 = vmul.f32 %v742_v46, %v725_v42  ;;  %v801_v36 = vperm.slane %v2121_v12, 0 }
 0x265   :  { %v750_v29 = vmul.f32 %v748_v1, %v743_v41  ;;  %v751_v34 = vmul.f32 %v748_v1, %v744_v52  ;;  %v2158_v1 = vld [vmem:[#allocation3 + $0x3] ss:$8 sm:$0x3] }
 0x266   :  { %v891_v52 = vld [vmem:[%s2457_s3] sm:$0xff]  ;;  %s1557_s3 = smov [#allocation6]  }
 0x267   :  { %v757_v53 = vadd.f32 %v755_v21, %v750_v29  ;;  %v758_v5 = vadd.f32 %v755_v21, %v751_v34  ;;  %v817_v21 = vperm.slane %v2158_v1, 0  ;;  %s1463_s29 = sshll.u32 %s1557_s3, 4  ;;  %s1464_s29 = int_to_ptr.vmem [resolvable:$true] %s1463_s29 }
 0x269   :  { %v2030_v31 = vmax.f32 %v757_v53, 0.0  ;;  %v2032_v37 = vmax.f32 %v758_v5, 0.0  ;;  %v868_v53 = vperm.slane %v2072_v27, 1 }
 0x26b   :  { %861 = vrot.lane.b32.xlu1 %v2032_v37, %s1549_s14  ;;  %859 = vrot.lane.b32.xlu2 %v2030_v31, %s1549_s14  ;;  %v2130_v20 = vand.u32 4294901760, %v2030_v31 }
 0x26c   :  { %875 = vrot.lane.b32.xlu0 %v2030_v31, %s1550_s1 }
 0x26d   :  { %v2152_v8 = vsub.f32 %v2030_v31, %v2130_v20 }
 0x26f   :  { %v980_v41 = vand.u32 4294901760, %v2152_v8 }
 0x273   :  { %809 = vrot.lane.b32.xlu1 %v2030_v31, %s1553_s19  ;;  %829 = vrot.lane.b32.xlu2 %v2032_v37, %s1552_s18 }
 0x274   :  { %877 = vrot.lane.b32.xlu0 %v2032_v37, %s1550_s1 }
 0x27b   :  { %795 = vrot.lane.b32.xlu1 %v2032_v37, %s1554_s20  ;;  %793 = vrot.lane.b32.xlu2 %v2030_v31, %s1554_s20 }
 0x27c   :  { %843 = vrot.lane.b32.xlu0 %v2030_v31, %s1551_s15 }
 0x283   :  { %761 = vrot.lane.b32.xlu1 %v2030_v31, %s1555_s21  ;;  %779 = vrot.lane.b32.xlu2 %v2032_v37, %s1548_s11 }
 0x284   :  { %845 = vrot.lane.b32.xlu0 %v2032_v37, %s1551_s15 }
 0x28c   :  { %827 = vrot.lane.b32.xlu0 %v2030_v31, %s1552_s18 }
 0x294   :  { %811 = vrot.lane.b32.xlu0 %v2032_v37, %s1553_s19 }
 0x29c   :  { %777 = vrot.lane.b32.xlu0 %v2030_v31, %s1548_s11 }
 0x2a4   :  { %763 = vrot.lane.b32.xlu0 %v2032_v37, %s1555_s21 }
 0x2ac   :  { %1442 = vperm.xlu0 %1487, %v1413_v50  }
 0x2b4   :  { %1449 = vperm.xlu0 %1487, %v1414_v7  }
 0x2c5   :  { %v2075_v54 = vpop.permute.xlu2 %859 }
 0x2cd   :  { %v2116_v26 = vpop.permute.xlu2 %829 }
 0x2d5   :  { %v2132_v40 = vpop.permute.xlu2 %793 }
 0x2dd   :  { %v2077_v63 = vpop.permute.xlu1 %861 }
 0x2de   :  { %v863_v38 = vsel %vm163_vm1, %v2075_v54, %v2077_v63  ;;  %v876_v25 = vpop.permute.xlu0 %875  ;;  %v864_v31 = vsel %vm163_vm1, %v2077_v63, %v2075_v54  ;;  %v981_v54 = vsub.f32 %v2152_v8, %v980_v41 }
 0x2df   :  { %v871_v51 = vmul.f32 %v867_v35, %v863_v38  ;;  %v911_v35 = vsel %vm214_vm6, %v891_v52, 0  ;;  %v852_v38 = vperm.slane %v2114_v45, 1 }
 0x2e1   :  { %v2085_v16 = vand.u32 4294901760, %v871_v51 }
 0x2e3   :  { %v2091_v18 = vsub.f32 %v871_v51, %v2085_v16 }
 0x2e5   :  { %v962_v32 = vand.u32 4294901760, %v2091_v18  ;;  %v2105_v48 = vpop.permute.xlu1 %809 }
 0x2e6   :  { %v878_v47 = vpop.permute.xlu0 %877 }
 0x2e7   :  { %v879_v10 = vsel %vm181_vm2, %v876_v25, %v878_v47  ;;  %v963_v30 = vsub.f32 %v2091_v18, %v962_v32  ;;  %v880_v2 = vsel %vm181_vm2, %v878_v47, %v876_v25 }
 0x2e8   :  { %v887_v17 = vmul.f32 %v883_v28, %v879_v10  ;;  %v888_v5 = vmul.f32 %v884_v43, %v880_v2  ;;  %v872_v28 = vmul.f32 %v868_v53, %v864_v31  ;;  %v836_v10 = vperm.slane %v2123_v13, 1 }
 0x2e9   :  { %v964_v58 = vand.u32 4294901760, %v963_v30 }
 0x2ea   :  { %v2093_v19 = vand.u32 4294901760, %v887_v17  ;;  %v2202_v47 = vand.u32 4294901760, %v888_v5 }
 0x2ec   :  { %v2096_v23 = vsub.f32 %v887_v17, %v2093_v19  ;;  %921 = vmatpush.msrb.mxu0 %v2093_v19  ;;  %1061 = vmatpush.msrb.mxu3 %v2093_v19  ;;  %v783_v17 = vld [vmem:[#allocation3 + $0x1] ss:$8 sm:$0x3]  ;;  %v2220_v13 = vsub.f32 %v888_v5, %v2202_v47 }
 0x2ed   :  { %v2125_v14 = vpop.permute.xlu1 %795  ;;  %v786_v5 = vperm.slane %v783_v17, 1 }
 0x2ee   :  { %v956_v33 = vand.u32 4294901760, %v2096_v23  ;;  %923 = vmatpush.msrb.mxu0 %v2085_v16  ;;  %1022 = vmatpush.msrb.mxu2 %v2096_v23  ;;  %v844_v39 = vpop.permute.xlu0 %843  ;;  %v798_v59 = vsel %vm89_vm5, %v2125_v14, %v2132_v40 }
 0x2ef   :  { %1063 = vmatpush.msrb.mxu3 %v2085_v16  ;;  %v805_v9 = vmul.f32 %v801_v36, %v798_v59  ;;  %v818_v59 = vperm.slane %v2158_v1, 1  ;;  %v797_v1 = vsel %vm89_vm5, %v2132_v40, %v2125_v14  ;;  %v2257_v14 = vand.u32 4294901760, %v2032_v37 }
 0x2f0   :  { %1025 = vmatpush.msrb.mxu2 %v2091_v18  ;;  %v957_v49 = vsub.f32 %v2096_v23, %v956_v33 }
 0x2f1   :  { %v2168_v29 = vand.u32 4294901760, %v805_v9 }
 0x2f2   :  { %v958_v57 = vand.u32 4294901760, %v957_v49  ;;  %v2205_v49 = vand.u32 4294901760, %v911_v35 }
 0x2f3   :  { %v2200_v24 = vsub.f32 %v805_v9, %v2168_v29  ;;  %v802_v9 = vperm.slane %v2121_v12, 1 }
 0x2f4   :  { %959 = vmatpush.msrb.mxu1 %v958_v57  ;;  %v2224_v36 = vsub.f32 %v911_v35, %v2205_v49 }
 0x2f5   :  { %v806_v35 = vmul.f32 %v802_v9, %v797_v1 }
 0x2f6   :  { %965 = vmatpush.msrb.mxu1 %v964_v58  ;;  %v846_v62 = vpop.permute.xlu0 %845  ;;  %v785_v58 = vperm.slane %v783_v17, 0 }
 0x2f7   :  { %v847_v6 = vsel %vm145_vm0, %v844_v39, %v846_v62  ;;  %v848_v63 = vsel %vm145_vm0, %v846_v62, %v844_v39 }
 0x2f8   :  { %v855_v11 = vmul.f32 %v851_v60, %v847_v6  ;;  %v856_v57 = vmul.f32 %v852_v38, %v848_v63  ;;  %v982_v60 = vand.u32 4294901760, %v981_v54  ;;  %v992_v6 = vand.u32 4294901760, %v2200_v24 }
 0x2fa   :  { %v2127_v15 = vand.u32 4294901760, %v855_v11 }
 0x2fc   :  { %925 = vmatpush.msrb.mxu0 %v2127_v15  ;;  %1065 = vmatpush.msrb.mxu3 %v2127_v15  ;;  %v2138_v42 = vsub.f32 %v855_v11, %v2127_v15  ;;  %v2217_v11 = vand.u32 4294901760, %v872_v28 }
 0x2fe   :  { %1028 = vmatpush.msrb.mxu2 %v2138_v42  ;;  %v828_v56 = vpop.permute.xlu0 %827  ;;  %v968_v0 = vand.u32 4294901760, %v2138_v42  ;;  %v2250_v52 = vsub.f32 %v872_v28, %v2217_v11  ;;  %v2271_v28 = vand.u32 4294901760, %v2224_v36 }
 0x2ff   :  { %v831_v3 = vsel %vm127_vm3, %v828_v56, %v2116_v26  ;;  %v832_v39 = vsel %vm127_vm3, %v2116_v26, %v828_v56 }
 0x300   :  { %v839_v22 = vmul.f32 %v835_v55, %v831_v3  ;;  %v969_v61 = vsub.f32 %v2138_v42, %v968_v0  ;;  %v840_v26 = vmul.f32 %v836_v10, %v832_v39  ;;  %v780_v55 = vpop.permute.xlu2 %779  ;;  %v1212_v17 = vand.u32 4294901760, %v2250_v52 }
 0x301   :  { %v2280_v39 = vsub.f32 %v2032_v37, %v2257_v14 }
 0x302   :  { %v2162_v44 = vand.u32 4294901760, %v839_v22  ;;  %v970_v46 = vand.u32 4294901760, %v969_v61  ;;  %v2253_v53 = vand.u32 4294901760, %v840_v26 }
 0x304   :  { %927 = vmatpush.msrb.mxu0 %v2162_v44  ;;  %971 = vmatpush.msrb.mxu1 %v970_v46  ;;  %v2172_v34 = vsub.f32 %v839_v22, %v2162_v44  ;;  %v2230_v22 = vand.u32 4294901760, %v856_v57  ;;  %v767_v46 = vld [vmem:[#allocation3] ss:$8 sm:$0x3]  ;;  %v2274_v10 = vsub.f32 %v840_v26, %v2253_v53 }
 0x305   :  { %1067 = vmatpush.msrb.mxu3 %v2162_v44  ;;  %v769_v54 = vperm.slane %v767_v46, 0  ;;  %v770_v63 = vperm.slane %v767_v46, 1 }
 0x306   :  { %1031 = vmatpush.msrb.mxu2 %v2172_v34  ;;  %v812_v50 = vpop.permute.xlu0 %811  ;;  %929 = vmatpush.msrb.mxu0 %v2130_v20  ;;  %v974_v7 = vand.u32 4294901760, %v2172_v34  ;;  %v2262_v38 = vsub.f32 %v856_v57, %v2230_v22  ;;  %v1224_v46 = vand.u32 4294901760, %v2274_v10 }
 0x307   :  { %v814_v27 = vsel %vm107_vm4, %v812_v50, %v2105_v48  ;;  %1069 = vmatpush.msrb.mxu3 %v2130_v20  ;;  %v813_v61 = vsel %vm107_vm4, %v2105_v48, %v812_v50  ;;  %v993_v48 = vsub.f32 %v2200_v24, %v992_v6 }
 0x308   :  { %v821_v25 = vmul.f32 %v817_v21, %v814_v27  ;;  %1034 = vmatpush.msrb.mxu2 %v2152_v8  ;;  %v975_v51 = vsub.f32 %v2172_v34, %v974_v7  ;;  %v1206_v21 = vand.u32 4294901760, %v2220_v13  ;;  %v822_v40 = vmul.f32 %v818_v59, %v813_v61 }
 0x309   :  { %v2289_v59 = vand.u32 4294901760, %v806_v35  ;;  %v1218_v9 = vand.u32 4294901760, %v2262_v38 }
 0x30a   :  { %v2210_v30 = vand.u32 4294901760, %v821_v25  ;;  %v976_v45 = vand.u32 4294901760, %v975_v51  ;;  %v2282_v57 = vand.u32 4294901760, %v822_v40  ;;  %v1207_v26 = vsub.f32 %v2220_v13, %v1206_v21 }
 0x30c   :  { %931 = vmatpush.msrb.mxu0 %v2210_v30  ;;  %977 = vmatpush.msrb.mxu1 %v976_v45  ;;  %v2214_v62 = vsub.f32 %v821_v25, %v2210_v30  ;;  %v994_v25 = vand.u32 4294901760, %v993_v48  ;;  %v762_v45 = vpop.permute.xlu1 %761  ;;  %v2306_v4 = vsub.f32 %v822_v40, %v2282_v57  ;;  %v1219_v40 = vsub.f32 %v2262_v38, %v1218_v9 }
 0x30d   :  { %1071 = vmatpush.msrb.mxu3 %v2210_v30 }
 0x30e   :  { %v778_v56 = vpop.permute.xlu0 %777  ;;  %933 = vmatpush.msrb.mxu0 %v2168_v29  ;;  %983 = vmatpush.msrb.mxu1 %v982_v60  ;;  %v986_v3 = vand.u32 4294901760, %v2214_v62 }
 0x30f   :  { %v782_v43 = vsel %vm71_vm7, %v780_v55, %v778_v56  ;;  %1037 = vmatpush.msrb.mxu2 %v2214_v62  ;;  %1073 = vmatpush.msrb.mxu3 %v2168_v29  ;;  %v781_v27 = vsel %vm71_vm7, %v778_v56, %v780_v55 }
 0x310   :  { %v789_v2 = vmul.f32 %v785_v58, %v782_v43  ;;  %v987_v12 = vsub.f32 %v2214_v62, %v986_v3  ;;  %v790_v58 = vmul.f32 %v786_v5, %v781_v27  ;;  %v2313_v27 = vsub.f32 %v806_v35, %v2289_v59 }
 0x311   :  { %1040 = vmatpush.msrb.mxu2 %v2200_v24 }
 0x312   :  { %v2259_v31 = vand.u32 4294901760, %v789_v2  ;;  %v988_v50 = vand.u32 4294901760, %v987_v12  ;;  %v1213_v12 = vsub.f32 %v2250_v52, %v1212_v17  ;;  %v2308_v48 = vand.u32 4294901760, %v790_v58 }
 0x314   :  { %935 = vmatpush.msrb.mxu0 %v2259_v31  ;;  %989 = vmatpush.msrb.mxu1 %v988_v50  ;;  %v2268_v51 = vsub.f32 %v789_v2, %v2259_v31  ;;  %v941_v2 = vsub.f32 %v2224_v36, %v2271_v28  ;;  %v1214_v35 = vand.u32 4294901760, %v1213_v12 }
 0x315   :  { %1075 = vmatpush.msrb.mxu3 %v2259_v31 }
 0x316   :  { %v764_v60 = vpop.permute.xlu0 %763  ;;  %995 = vmatpush.msrb.mxu1 %v994_v25  ;;  %1043 = vmatpush.msrb.mxu2 %v2268_v51  ;;  %v998_v55 = vand.u32 4294901760, %v2268_v51 }
 0x317   :  { %v765_v37 = vsel %vm54_vm8, %v762_v45, %v764_v60  ;;  %v766_v56 = vsel %vm54_vm8, %v764_v60, %v762_v45  ;;  %v2323_v60 = vand.u32 4294901760, %v941_v2  ;;  %v1242_v2 = vand.u32 4294901760, %v2313_v27 }
 0x318   :  { %v773_v61 = vmul.f32 %v769_v54, %v766_v56  ;;  %v774_v43 = vmul.f32 %v770_v63, %v765_v37  ;;  %v999_v1 = vsub.f32 %v2268_v51, %v998_v55  ;;  %v1208_v54 = vand.u32 4294901760, %v1207_v26 }
 0x319   :  { %v1230_v63 = vand.u32 4294901760, %v2280_v39  ;;  %v2329_v26 = vsub.f32 %v790_v58, %v2308_v48  ;;  %v1225_v37 = vsub.f32 %v2274_v10, %v1224_v46  ;;  %v1220_v58 = vand.u32 4294901760, %v1219_v40 }
 0x31a   :  { %v2310_v5 = vand.u32 4294901760, %v773_v61  ;;  %v1000_v50 = vand.u32 4294901760, %v999_v1  ;;  %v2316_v25 = vand.u32 4294901760, %v774_v43 }
 0x31b   :  { %v1231_v23 = vsub.f32 %v2280_v39, %v1230_v63  ;;  %v1226_v18 = vand.u32 4294901760, %v1225_v37  ;;  %v1248_v12 = vand.u32 4294901760, %v2329_v26 }
 0x31c   :  { %937 = vmatpush.msrb.mxu0 %v2310_v5  ;;  %1001 = vmatpush.msrb.mxu1 %v1000_v50  ;;  %v1003_v45 = vsub.f32 %v773_v61, %v2310_v5  ;;  %v1236_v61 = vand.u32 4294901760, %v2306_v4 }
 0x31d   :  { %1077 = vmatpush.msrb.mxu3 %v2310_v5  ;;  %943 = vmatmul.f32.vlgmr.msrb.gmra.mxu0 %v2323_v60  ;;  %v1232_v42 = vand.u32 4294901760, %v1231_v23 }
 0x31e   :  { %1095 = vmatpush.msra.mxu0 %v956_v33  ;;  %1046 = vmatpush.msrb.mxu2 %v1003_v45  ;;  %v1004_v56 = vand.u32 4294901760, %v1003_v45  ;;  %v2342_v33 = vsub.f32 %v774_v43, %v2316_v25  ;;  %v1237_v43 = vsub.f32 %v2306_v4, %v1236_v61 }
 0x31f   :  { %1209 = vmatpush.msra.mxu3 %v1208_v54  ;;  %1049 = vmatmul.f32.vlgmr.msrb.gmra.mxu2 %v2224_v36 }
 0x320   :  { %1099 = vmatpush.msra.mxu0 %v962_v32  ;;  %1171 = vmatpush.msra.mxu2 %v2202_v47  ;;  %v1005_v1 = vsub.f32 %v1003_v45, %v1004_v56  ;;  %v1254_v50 = vand.u32 4294901760, %v2342_v33  ;;  %v1238_v34 = vand.u32 4294901760, %v1237_v43 }
 0x321   :  { %1215 = vmatpush.msra.mxu3 %v1214_v35 }
 0x322   :  { %1103 = vmatpush.msra.mxu0 %v968_v0  ;;  %1173 = vmatpush.msra.mxu2 %v2217_v11  ;;  %v1006_v32 = vand.u32 4294901760, %v1005_v1  ;;  %v1243_v0 = vsub.f32 %v2313_v27, %v1242_v2 }
 0x323   :  { %1221 = vmatpush.msra.mxu3 %v1220_v58  ;;  %v1492_v58 = vld [vmem:[%s2454_s0] sm:$0xff] }
 0x324   :  { %1107 = vmatpush.msra.mxu0 %v974_v7  ;;  %1175 = vmatpush.msra.mxu2 %v2230_v22  ;;  %v1249_v7 = vsub.f32 %v2329_v26, %v1248_v12  ;;  %v1244_v8 = vand.u32 4294901760, %v1243_v0 }
 0x325   :  { %1227 = vmatpush.msra.mxu3 %v1226_v18  ;;  %1007 = vmatpush.msrb.mxu1 %v1006_v32 }
 0x326   :  { %1111 = vmatpush.msra.mxu0 %v980_v41  ;;  %1177 = vmatpush.msra.mxu2 %v2253_v53  ;;  %v1250_v41 = vand.u32 4294901760, %v1249_v7 }
 0x327   :  { %1141 = vmatpush.msra.mxu1 %v2093_v19  ;;  %1233 = vmatpush.msra.mxu3 %v1232_v42  ;;  %v1255_v19 = vsub.f32 %v2342_v33, %v1254_v50 }
 0x328   :  { %1115 = vmatpush.msra.mxu0 %v986_v3  ;;  %1179 = vmatpush.msra.mxu2 %v2257_v14 }
 0x329   :  { %1143 = vmatpush.msra.mxu1 %v2085_v16  ;;  %1239 = vmatpush.msra.mxu3 %v1238_v34  ;;  %v1256_v16 = vand.u32 4294901760, %v1255_v19 }
 0x32a   :  { %1119 = vmatpush.msra.mxu0 %v992_v6  ;;  %1181 = vmatpush.msra.mxu2 %v2282_v57 }
 0x32b   :  { %1145 = vmatpush.msra.mxu1 %v2127_v15  ;;  %1245 = vmatpush.msra.mxu3 %v1244_v8 }
 0x32c   :  { %1123 = vmatpush.msra.mxu0 %v998_v55  ;;  %1183 = vmatpush.msra.mxu2 %v2289_v59 }
 0x32d   :  { %1147 = vmatpush.msra.mxu1 %v2162_v44  ;;  %1251 = vmatpush.msra.mxu3 %v1250_v41 }
 0x32e   :  { %1127 = vmatpush.msra.mxu0 %v1004_v56  ;;  %1185 = vmatpush.msra.mxu2 %v2308_v48 }
 0x32f   :  { %1149 = vmatpush.msra.mxu1 %v2130_v20  ;;  %1257 = vmatpush.msra.mxu3 %v1256_v16 }
 0x330   :  { %1081 = vmatmul.f32.vlgmr.msrb.gmra.mxu3 %v2271_v28  ;;  %1272 = vmatpush.msrb.mxu0 %v2220_v13 }
 0x331   :  { %1391 = vmatpush.msrb.mxu3 %v2202_v47  ;;  %1151 = vmatpush.msra.mxu1 %v2210_v30 }
 0x332   :  { %1187 = vmatpush.msra.mxu2 %v2316_v25  ;;  %1275 = vmatpush.msrb.mxu0 %v2250_v52 }
 0x333   :  { %1393 = vmatpush.msrb.mxu3 %v2217_v11  ;;  %1153 = vmatpush.msra.mxu1 %v2168_v29 }
 0x334   :  { %1345 = vmatpush.msrb.mxu2 %v1206_v21  ;;  %1278 = vmatpush.msrb.mxu0 %v2262_v38 }
 0x335   :  { %1395 = vmatpush.msrb.mxu3 %v2230_v22  ;;  %1155 = vmatpush.msra.mxu1 %v2259_v31 }
 0x336   :  { %1349 = vmatpush.msrb.mxu2 %v1212_v17  ;;  %1281 = vmatpush.msrb.mxu0 %v2274_v10 }
 0x337   :  { %1009 = vmatmul.f32.vlgmr.msrb.gmra.mxu1 %v2205_v49  ;;  %1397 = vmatpush.msrb.mxu3 %v2253_v53 }
 0x338   :  { %1353 = vmatpush.msrb.mxu2 %v1218_v9  ;;  %1157 = vmatpush.msra.mxu1 %v2310_v5 }
 0x339   :  { %1284 = vmatpush.msrb.mxu0 %v2280_v39  ;;  %1399 = vmatpush.msrb.mxu3 %v2257_v14 }
 0x33a   :  { %1311 = vmatpush.msrb.mxu1 %v2202_v47  ;;  %1357 = vmatpush.msrb.mxu2 %v1224_v46 }
 0x33b   :  { %1287 = vmatpush.msrb.mxu0 %v2306_v4  ;;  %1401 = vmatpush.msrb.mxu3 %v2282_v57 }
 0x33c   :  { %1313 = vmatpush.msrb.mxu1 %v2217_v11  ;;  %1361 = vmatpush.msrb.mxu2 %v1230_v63  ;;  %v1443_v63 = vpop.permute.xlu0 %1442 }
 0x33d   :  { %1129 = vmatmul.f32.vlgmr.msra.gmra.mxu0 %v2205_v49  ;;  %1403 = vmatpush.msrb.mxu3 %v2289_v59 }
 0x33e   :  { %1315 = vmatpush.msrb.mxu1 %v2230_v22  ;;  %1290 = vmatpush.msrb.mxu0 %v2313_v27 }
 0x33f   :  { %1365 = vmatpush.msrb.mxu2 %v1236_v61  ;;  %1259 = vmatmul.f32.vlgmr.msra.gmra.mxu3 %v2205_v49 }
 0x340   :  { %1193 = vmatmul.f32.vlgmr.msra.gmra.mxu2 %v2323_v60  ;;  %1159 = vmatmul.f32.vlgmr.msra.gmra.mxu1 %v2205_v49 }
 0x341   :  { %1293 = vmatpush.msrb.mxu0 %v2329_v26  ;;  %1317 = vmatpush.msrb.mxu1 %v2253_v53 }
 0x342   :  { %1369 = vmatpush.msrb.mxu2 %v1242_v2  ;;  %1405 = vmatpush.msrb.mxu3 %v2308_v48  ;;  %v1493_v2 = vld [vmem:[%s2454_s0 + $0x8] sm:$0xff] }
 0x343   :  { %1296 = vmatpush.msrb.mxu0 %v2342_v33  ;;  %1319 = vmatpush.msrb.mxu1 %v2257_v14 }
 0x344   :  { %1373 = vmatpush.msrb.mxu2 %v1248_v12  ;;  %1407 = vmatpush.msrb.mxu3 %v2316_v25  ;;  %v1450_v61 = vpop.permute.xlu0 %1449 }
 0x345   :  { %1321 = vmatpush.msrb.mxu1 %v2282_v57  ;;  %1299 = vmatmul.f32.vlgmr.msrb.gmra.mxu0 %v2224_v36 }
 0x346   :  { %1377 = vmatpush.msrb.mxu2 %v1254_v50 }
 0x347   :  { %1323 = vmatpush.msrb.mxu1 %v2289_v59  ;;  %1409 = vmatmul.f32.vlgmr.msrb.gmra.mxu3 %v2205_v49 }
 0x348   :  { %1379 = vmatmul.f32.vlgmr.msrb.gmra.mxu2 %v2205_v49 }
 0x349   :  { %1325 = vmatpush.msrb.mxu1 %v2308_v48 }
 0x34b   :  { %1327 = vmatpush.msrb.mxu1 %v2316_v25 }
 0x34c   :  { %1331 = vmatmul.f32.vlgmr.msrb.gmra.mxu1 %v2271_v28 }
 0x39a   :  { %v944_v15 = vpop.f32.mrf.mxu0 }
 0x3a2   :  { %v1050_v29 = vpop.f32.mrf.mxu2 }
 0x3b3   :  { %v1082_v44 = vpop.f32.mrf.mxu3 }
 0x3b4   :  { %v1010_v20 = vpop.f32.mrf.mxu1 }
 0x3b5   :  { %v1011_v47 = vadd.f32 %v1010_v20, %v944_v15 }
 0x3b7   :  { %v1051_v62 = vadd.f32 %v1050_v29, %v1011_v47 }
 0x3b9   :  { %v1083_v3 = vadd.f32 %v1082_v44, %v1051_v62 }
 0x3ba   :  { %v1130_v24 = vpop.f32.mrf.mxu0 }
 0x3bb   :  { %v1131_v52 = vadd.f32 %v1130_v24, %v1083_v3 }
 0x3bd   :  { %v1160_v30 = vpop.f32.mrf.mxu1 }
 0x3be   :  { %v1161_v38 = vadd.f32 %v1160_v30, %v1131_v52 }
 0x3c2   :  { %v1260_v11 = vpop.f32.mrf.mxu3  ;;  %v1300_v36 = vpop.f32.mrf.mxu0 }
 0x3c3   :  { %v1194_v6 = vpop.f32.mrf.mxu2 }
 0x3c4   :  { %v1261_v13 = vadd.f32 %v1260_v11, %v1194_v6 }
 0x3c6   :  { %v1301_v49 = vadd.f32 %v1300_v36, %v1261_v13 }
 0x3c9   :  { %v1332_v22 = vpop.f32.mrf.mxu1 }
 0x3ca   :  { %v1333_v21 = vadd.f32 %v1332_v22, %v1301_v49  ;;  %v1410_v14 = vpop.f32.mrf.mxu3 }
 0x3cb   :  { %v1380_v53 = vpop.f32.mrf.mxu2 }
 0x3cc   :  { %v1381_v31 = vadd.f32 %v1380_v53, %v1333_v21 }
 0x3ce   :  { %v1411_v51 = vadd.f32 %v1410_v14, %v1381_v31 }
 0x3d0   :  { %v1415_v28 = vadd.f32 %v1411_v51, %v1161_v38 }
 0x3d2   :  { %1416 = vadd.xlane.f32.xlu2 %v1415_v28 }
 0x445   :  { %v1417_v10 = vpop.xlane.xlu2 %1416 }
 0x446   :  { %v1418_v17 = vmul.f32 0.00390625, %v1417_v10 }
 0x448   :  { %v1419_v39 = vsub.f32 %v1161_v38, %v1418_v17  ;;  %v1420_v57 = vsub.f32 %v1411_v51, %v1418_v17 }
 0x44a   :  { %v1421_v55 = vmul.f32 %v1419_v39, %v1419_v39  ;;  %v1422_v59 = vmul.f32 %v1420_v57, %v1420_v57 }
 0x44c   :  { %v1423_v9 = vadd.f32 %v1422_v59, %v1421_v55 }
 0x44e   :  { %1424 = vadd.xlane.f32.xlu1 %v1423_v9 }
 0x4c1   :  { %v1425_v46 = vpop.xlane.xlu1 %1424 }
 0x4c2   :  { %v1426_v4 = vmul.f32 0.00390625, %v1425_v46 }
 0x4c4   :  { %v1427_v48 = vadd.f32 1e-05, %v1426_v4 }
 0x4c6   :  { %1490 = vrsqrt.f32 %v1427_v48  ;;  %vm1434_vm13 = vweird.f32 %v1427_v48 }
 0x4cc   :  { %v1491_v5 = vpop.eup %1490 }
 0x4cd   :  { %v1429_v27 = vmul.f32 %v1491_v5, %v1427_v48  ;;  %vm1435_vm12 = vweird.f32 %v1491_v5 }
 0x4ce   :  { %vm1436_vm14 = vmor %vm1434_vm13, %vm1435_vm12 }
 0x4cf   :  { %v1430_v54 = vmul.f32 %v1491_v5, %v1429_v27 }
 0x4d1   :  { %v1431_v25 = vmul.f32 0.5, %v1430_v54 }
 0x4d3   :  { %v1432_v45 = vsub.f32 1.5, %v1431_v25 }
 0x4d5   :  { %v1433_v40 = vmul.f32 %v1491_v5, %v1432_v45 }
 0x4d7   :  { %v1437_v60 = vsel %vm1436_vm14, %v1491_v5, %v1433_v40 }
 0x4d8   :  { %v1438_v35 = vmul.f32 %v1437_v60, %v1419_v39  ;;  %v1439_v26 = vmul.f32 %v1437_v60, %v1420_v57 }
 0x4da   :  { %v1445_v37 = vmul.f32 %v1443_v63, %v1438_v35  ;;  %v1446_v56 = vmul.f32 %v1443_v63, %v1439_v26 }
 0x4dc   :  { %v1452_v23 = vadd.f32 %v1450_v61, %v1445_v37  ;;  %v1453_v33 = vadd.f32 %v1450_v61, %v1446_v56 }
 0x4de   :  { %v1454_v1 = vadd.f32 %v1492_v58, %v1452_v23  ;;  %v1455_v18 = vadd.f32 %v1493_v2, %v1453_v33 }
 0x4e0   :  { %1456 = vst [vmem:[#allocation6] sm:$0xff] %v1454_v1 }
 0x4e1   :  { %1457 = vst [vmem:[#allocation6 + $0x8] sm:$0xff] %v1455_v18 }
 0x4e2   :  { %1468 = dma.vmem_to_hbm [thread:$0]  %s1464_s29, 256, %s1466_s10, [#allocation5]  }
 0x4e3   :  { %1544 = dma.done.wait [#allocation5], 256  }
 0x4e4   :  { %1545 = vsyncadd [#allocation5], 4294967040 }
 0x4e5   :  { %1473 = vsyncpa [#allocation4], 1 }
 0x4e6   :  { %1474 = vsyncpa [#allocation5], 1 }

</bundles_post_ra>
